<compile_context>
chip_gen: v6e
topology: v6e:2x2x1
jax: 0.10.0
libtpu: 0.0.40
codegen_flags: <defaults>
</compile_context>

<pallas_src>
import jax
import jax.numpy as jnp
from jax import lax
from jax.experimental import pallas as pl
from jax.experimental.pallas import tpu as pltpu

_MXU_DTYPE = jnp.bfloat16  # matmul-input precision (f32 accumulation on MXU)


def _round_up(x, m):
    return ((x + m - 1) // m) * m


def _pad_channel_axis(arr, axis, c0, c0_pad, growth, g_pad):
    """Insert zero padding after each channel slab along `axis`.

    `arr` has cin = c0 + k*growth real channels laid out as
    [x (c0) | out_0 (growth) | ... | out_{k-1} (growth)]; the result has
    c0_pad + k*g_pad channels with each slab zero-padded to its 8-aligned
    width, matching the in-kernel resident-activation layout.
    """
    cin = arr.shape[axis]
    k = (cin - c0) // growth

    def pad_to(x, target):
        pads = [(0, 0)] * x.ndim
        pads[axis] = (0, target - x.shape[axis])
        return jnp.pad(x, pads)

    pieces = [pad_to(lax.slice_in_dim(arr, 0, c0, axis=axis), c0_pad)]
    for j in range(k):
        s = lax.slice_in_dim(arr, c0 + j * growth, c0 + (j + 1) * growth,
                             axis=axis)
        pieces.append(pad_to(s, g_pad))
    return jnp.concatenate(pieces, axis=axis)


def _make_dense_block_kernel(nb_layers, c0_pad, g_pad, h, w, bpi):
    """Builds the fused DenseBlock kernel for static shapes.

    bpi = images per grid block.  All channel counts are already 8-aligned.
    """
    hw = h * w
    padw = (h + 2) * w + 2                      # flat zero-bordered row length
    c_max_pad = c0_pad + (nb_layers - 1) * g_pad  # widest conv input (padded)

    def kernel(*refs):
        # refs = [x, (scale_i, shift_i, wtaps_i) * nb_layers, out, ypad]
        x_ref = refs[0]                           # (bpi, c0_pad, hw)   f32
        o_ref = refs[1 + 3 * nb_layers]           # (bpi, c_pad_tot, hw) f32
        ypad_ref = refs[2 + 3 * nb_layers]        # (bpi, c_max_pad, padw) bf16

        # Horizontal validity masks per OUTPUT column (the flat zero border
        # handles vertical padding; only left/right column wrap needs masking).
        col = jax.lax.broadcasted_iota(jnp.int32, (1, hw), 1) % w
        keep_left = col > 0          # tap dw == 0 would read column w-1
        keep_right = col < (w - 1)   # tap dw == 2 would read column w+1

        # Zero only the 1-row flat border (w+1 lanes at each end) of every
        # image's padded buffer.  Invariant: border lanes are never written by
        # layer stores, and the interior is fully rewritten before every read.
        zeros_border = jnp.zeros((bpi, c_max_pad, w + 1), _MXU_DTYPE)
        ypad_ref[:, :, 0:w + 1] = zeros_border
        ypad_ref[:, :, w + 1 + hw:padw] = zeros_border

        # The output block doubles as the VMEM-resident concatenated
        # activation (padded channel slabs; padding rows of x are zero).
        o_ref[:, 0:c0_pad, :] = x_ref[...]

        for i in range(nb_layers):                # static unroll over layers
            cin_pad = c0_pad + i * g_pad
            scale = refs[1 + 3 * i][...]          # (cin_pad, 1)        f32
            shift = refs[2 + 3 * i][...]          # (cin_pad, 1)        f32
            wtaps_ref = refs[3 + 3 * i]           # (9, g_pad, cin_pad) bf16

            for m in range(bpi):                  # static unroll over images
                # Fused inference BatchNorm + ReLU over the concatenated
                # prefix (f32 VPU math; cast to bf16 only for the MXU).
                # Padding rows have scale=shift=0 -> y row = 0.
                xin = o_ref[m, 0:cin_pad, :]      # aligned (cin_pad, hw) read
                y = jnp.maximum(xin * scale + shift, 0.0)
                ypad_ref[m, 0:cin_pad, w + 1:w + 1 + hw] = y.astype(_MXU_DTYPE)

                # 3x3 conv = 9 accumulating dots on lane-shifted slices of the
                # padded buffer (no patch matrix; f32 vreg accumulator).
                acc = jnp.zeros((g_pad, hw), jnp.float32)
                for dh in range(3):
                    for dw in range(3):
                        off = dh * w + dw
                        piece = ypad_ref[m, 0:cin_pad, off:off + hw]
                        r = jnp.dot(wtaps_ref[dh * 3 + dw], piece,
                                    preferred_element_type=jnp.float32)
                        if dw == 0:
                            r = jnp.where(keep_left, r, jnp.zeros_like(r))
                        elif dw == 2:
                            r = jnp.where(keep_right, r, jnp.zeros_like(r))
                        acc = acc + r

                # Full-vreg aligned store of the new (padded) channel slab.
                o_ref[m, cin_pad:cin_pad + g_pad, :] = acc.astype(o_ref.dtype)

    return kernel


def dense_block_forward(x_nchw, params, images_per_block=None):
    """DenseBlock.forward; NCHW in/out like PyTorch, one pallas_call."""
    n, c0, h, w = x_nchw.shape
    nb_layers = len(params)
    growth = params[0]["w"].shape[-1]
    hw = h * w
    padw = (h + 2) * w + 2

    c0_pad = _round_up(c0, 8)
    g_pad = _round_up(growth, 8)
    c_total = c0 + nb_layers * growth
    c_pad_total = c0_pad + nb_layers * g_pad
    c_max_pad = c0_pad + (nb_layers - 1) * g_pad

    # Images per grid step.  Default keeps >= 2 grid steps when n >= 2 (so a
    # v7x chip uses both TensorCores); extra batch beyond 2 gets folded into
    # each step to amortize per-step pipeline overhead.  Single-TC v5e/v6e
    # callers may pass images_per_block=n for one fat step.
    if images_per_block is None:
        cand = max(1, n // 2)
        images_per_block = cand if n % cand == 0 else 1
    bpi = images_per_block
    assert n % bpi == 0, (n, bpi)
    nblocks = n // bpi

    # ---- host-side parameter / input prep (runs once, outside the kernel) ---
    x_flat = x_nchw.reshape(n, c0, hw).astype(jnp.float32)
    x_pad = jnp.pad(x_flat, ((0, 0), (0, c0_pad - c0), (0, 0)))  # zero pad rows

    inputs = [x_pad]
    in_specs = [pl.BlockSpec((bpi, c0_pad, hw), lambda i: (i, 0, 0))]
    for li, p in enumerate(params):
        cin = c0 + li * growth
        cin_pad = c0_pad + li * g_pad

        scale = _pad_channel_axis(p["scale"].reshape(cin, 1).astype(jnp.float32),
                                  0, c0, c0_pad, growth, g_pad)
        shift = _pad_channel_axis(p["shift"].reshape(cin, 1).astype(jnp.float32),
                                  0, c0, c0_pad, growth, g_pad)

        # HWIO (3,3,Cin,Cout) -> (9, Cout, Cin) tap-major, then zero-pad Cout
        # to g_pad and scatter Cin into the padded channel-slab positions so
        # weight rows for padding channels are exactly zero.
        w9 = jnp.transpose(p["w"], (0, 1, 3, 2)).reshape(9, growth, cin)
        w9 = jnp.pad(w9, ((0, 0), (0, g_pad - growth), (0, 0)))
        wtaps = _pad_channel_axis(w9, 2, c0, c0_pad, growth, g_pad)
        wtaps = wtaps.astype(_MXU_DTYPE)          # (9, g_pad, cin_pad)

        inputs += [scale, shift, wtaps]
        in_specs += [
            pl.BlockSpec((cin_pad, 1), lambda i: (0, 0)),
            pl.BlockSpec((cin_pad, 1), lambda i: (0, 0)),
            pl.BlockSpec((9, g_pad, cin_pad), lambda i: (0, 0, 0)),
        ]

    kernel = _make_dense_block_kernel(nb_layers, c0_pad, g_pad, h, w, bpi)

    # Advisory cost estimate (helps XLA overlap this call inside a model).
    flops = 0
    for i in range(nb_layers):
        cin = c0 + i * growth
        flops += n * hw * (2 * 9 * cin * growth + 3 * cin)
    param_bytes = sum(int(a.size) * a.dtype.itemsize for a in inputs[1:])
    bytes_accessed = int(x_pad.size) * 4 + n * c_pad_total * hw * 4 + param_bytes
    cost = pl.CostEstimate(flops=int(flops), transcendentals=0,
                           bytes_accessed=int(bytes_accessed))

    out = pl.pallas_call(
        kernel,
        out_shape=jax.ShapeDtypeStruct((n, c_pad_total, hw), jnp.float32),
        grid=(nblocks,),
        in_specs=in_specs,
        out_specs=pl.BlockSpec((bpi, c_pad_total, hw), lambda i: (i, 0, 0)),
        scratch_shapes=[
            pltpu.VMEM((bpi, c_max_pad, padw), _MXU_DTYPE),  # padded activation
        ],
        compiler_params=pltpu.CompilerParams(
            dimension_semantics=("parallel",)),
        cost_estimate=cost,
    )(*inputs)

    # Strip the 8-alignment padding channels: slabs are
    # [c0_pad | g_pad | g_pad | ...] with [c0 | growth | growth | ...] real.
    pieces = [out[:, 0:c0, :]]
    for j in range(nb_layers):
        base = c0_pad + j * g_pad
        pieces.append(out[:, base:base + growth, :])
    return jnp.concatenate(pieces, axis=1).reshape(n, c_total, h, w)


def make_dense_block_params(key, nb_layers, in_planes, growth_rate):
    """Deterministic synthetic parameters (shapes match the PyTorch module)."""
    params = []
    eps = 1e-5
    for i in range(nb_layers):
        cin = in_planes + i * growth_rate
        k = jax.random.fold_in(key, i)
        kw, kg, kb, km, kv = jax.random.split(k, 5)
        wgt = jax.random.normal(kw, (3, 3, cin, growth_rate), jnp.float32)
        wgt = wgt * (2.0 / (9.0 * cin)) ** 0.5  # kaiming-ish
        gamma = 1.0 + 0.1 * jax.random.normal(kg, (cin,), jnp.float32)
        beta = 0.1 * jax.random.normal(kb, (cin,), jnp.float32)
        run_mean = 0.1 * jax.random.normal(km, (cin,), jnp.float32)
        run_var = jnp.abs(jax.random.normal(kv, (cin,), jnp.float32)) + 0.5
        scale = gamma / jnp.sqrt(run_var + eps)
        shift = beta - run_mean * scale
        params.append({"w": wgt, "scale": scale, "shift": shift})
    return params


def dense_block_reference(x_nchw, params):
    """Pure-JAX reference (XLA conv), same bf16-multiply / f32-accumulate."""
    x = jnp.transpose(x_nchw, (0, 2, 3, 1))  # NCHW -> NHWC
    for p in params:
        y = jnp.maximum(
            x * p["scale"].reshape(1, 1, 1, -1) + p["shift"].reshape(1, 1, 1, -1),
            0.0)
        out = jax.lax.conv_general_dilated(
            y.astype(_MXU_DTYPE), p["w"].astype(_MXU_DTYPE),
            window_strides=(1, 1), padding="SAME",
            dimension_numbers=("NHWC", "HWIO", "NHWC"),
            preferred_element_type=jnp.float32)
        x = jnp.concatenate([x, out], axis=-1)
    return jnp.transpose(x, (0, 3, 1, 2))  # NHWC -> NCHW


if __name__ == "__main__":
    # DenseBlock(nb_layers=3, in_planes=4, growth_rate=4, block=BasicBlock)
    # TODO(synk): dropout (dropRate>0) and training-mode BatchNorm statistics
    # are not modeled; dropRate defaults to 0.0 and BN uses running stats.
    nb_layers, in_planes, growth_rate = 3, 4, 4
    n, h, w = 2, 16, 16

    key = jax.random.PRNGKey(0)
    kx, kp = jax.random.split(key)
    x = jax.random.normal(kx, (n, in_planes, h, w), jnp.float32)  # NCHW input
    params = make_dense_block_params(kp, nb_layers, in_planes, growth_rate)

    out = jax.block_until_ready(dense_block_forward(x, params))

    expected_c = in_planes + nb_layers * growth_rate
    assert out.shape == (n, expected_c, h, w), out.shape

    ref = jax.block_until_ready(dense_block_reference(x, params))
    # Both kernel and reference use bf16 MXU inputs with f32 accumulation, so
    # remaining differences are summation order + rare 1-ulp bf16 rounding.
    max_err = float(jnp.max(jnp.abs(out - ref)))
    assert jnp.allclose(out, ref, atol=1e-2, rtol=1e-2), max_err

    print("KERNEL_OK")
</pallas_src>

<mosaic_0001>
module attributes {stable_mosaic.version = 11 : i64} {
  func.func @kernel(%arg0: i32, %arg1: memref<1x8x256xf32, #tpu.memory_space<vmem>>, %arg2: memref<8x1xf32, #tpu.memory_space<vmem>>, %arg3: memref<8x1xf32, #tpu.memory_space<vmem>>, %arg4: memref<9x8x8xbf16, #tpu.memory_space<vmem>>, %arg5: memref<16x1xf32, #tpu.memory_space<vmem>>, %arg6: memref<16x1xf32, #tpu.memory_space<vmem>>, %arg7: memref<9x8x16xbf16, #tpu.memory_space<vmem>>, %arg8: memref<24x1xf32, #tpu.memory_space<vmem>>, %arg9: memref<24x1xf32, #tpu.memory_space<vmem>>, %arg10: memref<9x8x24xbf16, #tpu.memory_space<vmem>>, %arg11: memref<1x32x256xf32, #tpu.memory_space<vmem>>, %arg12: memref<1x24x290xbf16, #tpu.memory_space<vmem>>) attributes {dimension_semantics = [#tpu.dimension_semantics<parallel>], iteration_bounds = array<i64: 2>, scalar_prefetch = 0 : i64, scratch_operands = 1 : i64, tpu.core_type = #tpu.core_type<tc>, window_params = [{transform_indices = @transform_0, window_bounds = array<i64: 1, 8, 256>}, {pipeline_mode = #tpu.pipeline_mode<synchronous>, transform_indices = @transform_1, window_bounds = array<i64: 8, 1>}, {pipeline_mode = #tpu.pipeline_mode<synchronous>, transform_indices = @transform_2, window_bounds = array<i64: 8, 1>}, {pipeline_mode = #tpu.pipeline_mode<synchronous>, transform_indices = @transform_3, window_bounds = array<i64: 9, 8, 8>}, {pipeline_mode = #tpu.pipeline_mode<synchronous>, transform_indices = @transform_4, window_bounds = array<i64: 16, 1>}, {pipeline_mode = #tpu.pipeline_mode<synchronous>, transform_indices = @transform_5, window_bounds = array<i64: 16, 1>}, {pipeline_mode = #tpu.pipeline_mode<synchronous>, transform_indices = @transform_6, window_bounds = array<i64: 9, 8, 16>}, {pipeline_mode = #tpu.pipeline_mode<synchronous>, transform_indices = @transform_7, window_bounds = array<i64: 24, 1>}, {pipeline_mode = #tpu.pipeline_mode<synchronous>, transform_indices = @transform_8, window_bounds = array<i64: 24, 1>}, {pipeline_mode = #tpu.pipeline_mode<synchronous>, transform_indices = @transform_9, window_bounds = array<i64: 9, 8, 24>}, {transform_indices = @transform_10, window_bounds = array<i64: 1, 32, 256>}]} {
    %0 = tpu.iota {dimensions = array<i32: 1>} : vector<1x256xi32>
    %c16_i32 = arith.constant 16 : i32
    %c0_i32 = arith.constant 0 : i32
    %1 = arith.cmpi eq, %c16_i32, %c0_i32 : i32
    %c1_i32 = arith.constant 1 : i32
    %2 = arith.select %1, %c1_i32, %c16_i32 : i32
    %3 = vector.broadcast %2 : i32 to vector<1x256xi32>
    %4 = arith.remsi %0, %3 : vector<1x256xi32>
    %c0_i32_0 = arith.constant 0 : i32
    %5 = vector.broadcast %c0_i32_0 : i32 to vector<1x256xi32>
    %6 = arith.cmpi ne, %4, %5 : vector<1x256xi32>
    %c0_i32_1 = arith.constant 0 : i32
    %7 = vector.broadcast %c0_i32_1 : i32 to vector<1x256xi32>
    %8 = arith.cmpi slt, %4, %7 : vector<1x256xi32>
    %c0_i32_2 = arith.constant 0 : i32
    %9 = arith.cmpi slt, %2, %c0_i32_2 : i32
    %10 = vector.broadcast %9 : i1 to vector<1x256xi1>
    %11 = vector.broadcast %10 : vector<1x256xi1> to vector<1x256xi1>
    %12 = arith.xori %8, %11 : vector<1x256xi1>
    %13 = arith.andi %12, %6 : vector<1x256xi1>
    %14 = vector.broadcast %2 : i32 to vector<1x256xi32>
    %15 = arith.addi %4, %14 : vector<1x256xi32>
    %16 = arith.select %13, %15, %4 : vector<1x256xi1>, vector<1x256xi32>
    %c0_i32_3 = arith.constant 0 : i32
    %17 = vector.broadcast %c0_i32_3 : i32 to vector<1x256xi32>
    %18 = arith.cmpi sgt, %16, %17 : vector<1x256xi32>
    %c15_i32 = arith.constant 15 : i32
    %19 = vector.broadcast %c15_i32 : i32 to vector<1x256xi32>
    %20 = arith.cmpi slt, %16, %19 : vector<1x256xi32>
    %cst = arith.constant 0.000000e+00 : bf16
    %21 = vector.broadcast %cst : bf16 to vector<1x24x17xbf16>
    %c0 = arith.constant 0 : index
    %c0_4 = arith.constant 0 : index
    %c0_5 = arith.constant 0 : index
    %22 = vector.load %arg12[%c0, %c0_4, %c0_5] : memref<1x24x290xbf16, #tpu.memory_space<vmem>>, vector<1x24x17xbf16>
    tpu.vector_store %arg12[%c0, %c0_4, %c0_5], %21 {strides = array<i32>} : memref<1x24x290xbf16, #tpu.memory_space<vmem>>, vector<1x24x17xbf16>,
    %c0_6 = arith.constant 0 : index
    %c0_7 = arith.constant 0 : index
    %c273 = arith.constant 273 : index
    %23 = vector.load %arg12[%c0_6, %c0_7, %c273] : memref<1x24x290xbf16, #tpu.memory_space<vmem>>, vector<1x24x17xbf16>
    tpu.vector_store %arg12[%c0_6, %c0_7, %c273], %21 {strides = array<i32>} : memref<1x24x290xbf16, #tpu.memory_space<vmem>>, vector<1x24x17xbf16>,
    %c0_8 = arith.constant 0 : index
    %c0_9 = arith.constant 0 : index
    %c0_10 = arith.constant 0 : index
    %24 = vector.load %arg1[%c0_8, %c0_9, %c0_10] : memref<1x8x256xf32, #tpu.memory_space<vmem>>, vector<1x8x256xf32>
    %c0_11 = arith.constant 0 : index
    %c0_12 = arith.constant 0 : index
    %c0_13 = arith.constant 0 : index
    %25 = vector.load %arg11[%c0_11, %c0_12, %c0_13] : memref<1x32x256xf32, #tpu.memory_space<vmem>>, vector<1x8x256xf32>
    tpu.vector_store %arg11[%c0_11, %c0_12, %c0_13], %24 {strides = array<i32>} : memref<1x32x256xf32, #tpu.memory_space<vmem>>, vector<1x8x256xf32>,
    %c0_14 = arith.constant 0 : index
    %c0_15 = arith.constant 0 : index
    %26 = vector.load %arg2[%c0_14, %c0_15] : memref<8x1xf32, #tpu.memory_space<vmem>>, vector<8x1xf32>
    %c0_16 = arith.constant 0 : index
    %c0_17 = arith.constant 0 : index
    %27 = vector.load %arg3[%c0_16, %c0_17] : memref<8x1xf32, #tpu.memory_space<vmem>>, vector<8x1xf32>
    %c0_18 = arith.constant 0 : index
    %c0_19 = arith.constant 0 : index
    %c0_20 = arith.constant 0 : index
    %28 = vector.load %arg11[%c0_18, %c0_19, %c0_20] : memref<1x32x256xf32, #tpu.memory_space<vmem>>, vector<1x8x256xf32>
    %29 = vector.shape_cast %28 : vector<1x8x256xf32> to vector<8x256xf32>
    %30 = vector.broadcast %26 : vector<8x1xf32> to vector<8x256xf32>
    %31 = arith.mulf %29, %30 : vector<8x256xf32>
    %32 = vector.broadcast %27 : vector<8x1xf32> to vector<8x256xf32>
    %33 = arith.addf %31, %32 : vector<8x256xf32>
    %cst_21 = arith.constant 0.000000e+00 : f32
    %34 = vector.broadcast %cst_21 : f32 to vector<8x256xf32>
    %35 = arith.maximumf %33, %34 : vector<8x256xf32>
    %36 = arith.truncf %35 : vector<8x256xf32> to vector<8x256xbf16>
    %c0_22 = arith.constant 0 : index
    %c0_23 = arith.constant 0 : index
    %c17 = arith.constant 17 : index
    %37 = vector.load %arg12[%c0_22, %c0_23, %c17] : memref<1x24x290xbf16, #tpu.memory_space<vmem>>, vector<1x8x256xbf16>
    %38 = vector.shape_cast %37 : vector<1x8x256xbf16> to vector<8x256xbf16>
    %39 = vector.shape_cast %36 : vector<8x256xbf16> to vector<1x8x256xbf16>
    tpu.vector_store %arg12[%c0_22, %c0_23, %c17], %39 {strides = array<i32>} : memref<1x24x290xbf16, #tpu.memory_space<vmem>>, vector<1x8x256xbf16>,
    %cst_24 = arith.constant 0.000000e+00 : f32
    %40 = vector.broadcast %cst_24 : f32 to vector<8x256xf32>
    %c0_25 = arith.constant 0 : index
    %c0_26 = arith.constant 0 : index
    %c0_27 = arith.constant 0 : index
    %41 = vector.load %arg12[%c0_25, %c0_26, %c0_27] : memref<1x24x290xbf16, #tpu.memory_space<vmem>>, vector<1x8x256xbf16>
    %42 = vector.shape_cast %41 : vector<1x8x256xbf16> to vector<8x256xbf16>
    %c0_28 = arith.constant 0 : index
    %c0_29 = arith.constant 0 : index
    %c0_30 = arith.constant 0 : index
    %43 = vector.load %arg4[%c0_28, %c0_29, %c0_30] : memref<9x8x8xbf16, #tpu.memory_space<vmem>>, vector<1x8x8xbf16>
    %44 = vector.shape_cast %43 : vector<1x8x8xbf16> to vector<8x8xbf16>
    %cst_31 = arith.constant dense<0.000000e+00> : vector<8x256xf32>
    %45 = tpu.matmul %44, %42, %cst_31 {dimension_numbers = #tpu.dot_dimension_numbers<[1], [0], [0], [1], [0, 0, 1, 1], [], []>} : vector<8x8xbf16>, vector<8x256xbf16>, vector<8x256xf32> -> vector<8x256xf32>
    %cst_32 = arith.constant 0.000000e+00 : f32
    %46 = vector.broadcast %cst_32 : f32 to vector<8x256xf32>
    %47 = vector.shape_cast %18 : vector<1x256xi1> to vector<1x256xi1>
    %48 = vector.broadcast %47 : vector<1x256xi1> to vector<8x256xi1>
    %49 = arith.select %48, %45, %46 : vector<8x256xi1>, vector<8x256xf32>
    %50 = arith.addf %40, %49 : vector<8x256xf32>
    %c0_33 = arith.constant 0 : index
    %c0_34 = arith.constant 0 : index
    %c1 = arith.constant 1 : index
    %51 = vector.load %arg12[%c0_33, %c0_34, %c1] : memref<1x24x290xbf16, #tpu.memory_space<vmem>>, vector<1x8x256xbf16>
    %52 = vector.shape_cast %51 : vector<1x8x256xbf16> to vector<8x256xbf16>
    %c1_35 = arith.constant 1 : index
    %c0_36 = arith.constant 0 : index
    %c0_37 = arith.constant 0 : index
    %53 = vector.load %arg4[%c1_35, %c0_36, %c0_37] : memref<9x8x8xbf16, #tpu.memory_space<vmem>>, vector<1x8x8xbf16>
    %54 = vector.shape_cast %53 : vector<1x8x8xbf16> to vector<8x8xbf16>
    %cst_38 = arith.constant dense<0.000000e+00> : vector<8x256xf32>
    %55 = tpu.matmul %54, %52, %cst_38 {dimension_numbers = #tpu.dot_dimension_numbers<[1], [0], [0], [1], [0, 0, 1, 1], [], []>} : vector<8x8xbf16>, vector<8x256xbf16>, vector<8x256xf32> -> vector<8x256xf32>
    %56 = arith.addf %50, %55 : vector<8x256xf32>
    %c0_39 = arith.constant 0 : index
    %c0_40 = arith.constant 0 : index
    %c2 = arith.constant 2 : index
    %57 = vector.load %arg12[%c0_39, %c0_40, %c2] : memref<1x24x290xbf16, #tpu.memory_space<vmem>>, vector<1x8x256xbf16>
    %58 = vector.shape_cast %57 : vector<1x8x256xbf16> to vector<8x256xbf16>
    %c2_41 = arith.constant 2 : index
    %c0_42 = arith.constant 0 : index
    %c0_43 = arith.constant 0 : index
    %59 = vector.load %arg4[%c2_41, %c0_42, %c0_43] : memref<9x8x8xbf16, #tpu.memory_space<vmem>>, vector<1x8x8xbf16>
    %60 = vector.shape_cast %59 : vector<1x8x8xbf16> to vector<8x8xbf16>
    %cst_44 = arith.constant dense<0.000000e+00> : vector<8x256xf32>
    %61 = tpu.matmul %60, %58, %cst_44 {dimension_numbers = #tpu.dot_dimension_numbers<[1], [0], [0], [1], [0, 0, 1, 1], [], []>} : vector<8x8xbf16>, vector<8x256xbf16>, vector<8x256xf32> -> vector<8x256xf32>
    %cst_45 = arith.constant 0.000000e+00 : f32
    %62 = vector.broadcast %cst_45 : f32 to vector<8x256xf32>
    %63 = vector.shape_cast %20 : vector<1x256xi1> to vector<1x256xi1>
    %64 = vector.broadcast %63 : vector<1x256xi1> to vector<8x256xi1>
    %65 = arith.select %64, %61, %62 : vector<8x256xi1>, vector<8x256xf32>
    %66 = arith.addf %56, %65 : vector<8x256xf32>
    %c0_46 = arith.constant 0 : index
    %c0_47 = arith.constant 0 : index
    %c16 = arith.constant 16 : index
    %67 = vector.load %arg12[%c0_46, %c0_47, %c16] : memref<1x24x290xbf16, #tpu.memory_space<vmem>>, vector<1x8x256xbf16>
    %68 = vector.shape_cast %67 : vector<1x8x256xbf16> to vector<8x256xbf16>
    %c3 = arith.constant 3 : index
    %c0_48 = arith.constant 0 : index
    %c0_49 = arith.constant 0 : index
    %69 = vector.load %arg4[%c3, %c0_48, %c0_49] : memref<9x8x8xbf16, #tpu.memory_space<vmem>>, vector<1x8x8xbf16>
    %70 = vector.shape_cast %69 : vector<1x8x8xbf16> to vector<8x8xbf16>
    %cst_50 = arith.constant dense<0.000000e+00> : vector<8x256xf32>
    %71 = tpu.matmul %70, %68, %cst_50 {dimension_numbers = #tpu.dot_dimension_numbers<[1], [0], [0], [1], [0, 0, 1, 1], [], []>} : vector<8x8xbf16>, vector<8x256xbf16>, vector<8x256xf32> -> vector<8x256xf32>
    %cst_51 = arith.constant 0.000000e+00 : f32
    %72 = vector.broadcast %cst_51 : f32 to vector<8x256xf32>
    %73 = vector.shape_cast %18 : vector<1x256xi1> to vector<1x256xi1>
    %74 = vector.broadcast %73 : vector<1x256xi1> to vector<8x256xi1>
    %75 = arith.select %74, %71, %72 : vector<8x256xi1>, vector<8x256xf32>
    %76 = arith.addf %66, %75 : vector<8x256xf32>
    %c0_52 = arith.constant 0 : index
    %c0_53 = arith.constant 0 : index
    %c17_54 = arith.constant 17 : index
    %77 = vector.load %arg12[%c0_52, %c0_53, %c17_54] : memref<1x24x290xbf16, #tpu.memory_space<vmem>>, vector<1x8x256xbf16>
    %78 = vector.shape_cast %77 : vector<1x8x256xbf16> to vector<8x256xbf16>
    %c4 = arith.constant 4 : index
    %c0_55 = arith.constant 0 : index
    %c0_56 = arith.constant 0 : index
    %79 = vector.load %arg4[%c4, %c0_55, %c0_56] : memref<9x8x8xbf16, #tpu.memory_space<vmem>>, vector<1x8x8xbf16>
    %80 = vector.shape_cast %79 : vector<1x8x8xbf16> to vector<8x8xbf16>
    %cst_57 = arith.constant dense<0.000000e+00> : vector<8x256xf32>
    %81 = tpu.matmul %80, %78, %cst_57 {dimension_numbers = #tpu.dot_dimension_numbers<[1], [0], [0], [1], [0, 0, 1, 1], [], []>} : vector<8x8xbf16>, vector<8x256xbf16>, vector<8x256xf32> -> vector<8x256xf32>
    %82 = arith.addf %76, %81 : vector<8x256xf32>
    %c0_58 = arith.constant 0 : index
    %c0_59 = arith.constant 0 : index
    %c18 = arith.constant 18 : index
    %83 = vector.load %arg12[%c0_58, %c0_59, %c18] : memref<1x24x290xbf16, #tpu.memory_space<vmem>>, vector<1x8x256xbf16>
    %84 = vector.shape_cast %83 : vector<1x8x256xbf16> to vector<8x256xbf16>
    %c5 = arith.constant 5 : index
    %c0_60 = arith.constant 0 : index
    %c0_61 = arith.constant 0 : index
    %85 = vector.load %arg4[%c5, %c0_60, %c0_61] : memref<9x8x8xbf16, #tpu.memory_space<vmem>>, vector<1x8x8xbf16>
    %86 = vector.shape_cast %85 : vector<1x8x8xbf16> to vector<8x8xbf16>
    %cst_62 = arith.constant dense<0.000000e+00> : vector<8x256xf32>
    %87 = tpu.matmul %86, %84, %cst_62 {dimension_numbers = #tpu.dot_dimension_numbers<[1], [0], [0], [1], [0, 0, 1, 1], [], []>} : vector<8x8xbf16>, vector<8x256xbf16>, vector<8x256xf32> -> vector<8x256xf32>
    %cst_63 = arith.constant 0.000000e+00 : f32
    %88 = vector.broadcast %cst_63 : f32 to vector<8x256xf32>
    %89 = vector.shape_cast %20 : vector<1x256xi1> to vector<1x256xi1>
    %90 = vector.broadcast %89 : vector<1x256xi1> to vector<8x256xi1>
    %91 = arith.select %90, %87, %88 : vector<8x256xi1>, vector<8x256xf32>
    %92 = arith.addf %82, %91 : vector<8x256xf32>
    %c0_64 = arith.constant 0 : index
    %c0_65 = arith.constant 0 : index
    %c32 = arith.constant 32 : index
    %93 = vector.load %arg12[%c0_64, %c0_65, %c32] : memref<1x24x290xbf16, #tpu.memory_space<vmem>>, vector<1x8x256xbf16>
    %94 = vector.shape_cast %93 : vector<1x8x256xbf16> to vector<8x256xbf16>
    %c6 = arith.constant 6 : index
    %c0_66 = arith.constant 0 : index
    %c0_67 = arith.constant 0 : index
    %95 = vector.load %arg4[%c6, %c0_66, %c0_67] : memref<9x8x8xbf16, #tpu.memory_space<vmem>>, vector<1x8x8xbf16>
    %96 = vector.shape_cast %95 : vector<1x8x8xbf16> to vector<8x8xbf16>
    %cst_68 = arith.constant dense<0.000000e+00> : vector<8x256xf32>
    %97 = tpu.matmul %96, %94, %cst_68 {dimension_numbers = #tpu.dot_dimension_numbers<[1], [0], [0], [1], [0, 0, 1, 1], [], []>} : vector<8x8xbf16>, vector<8x256xbf16>, vector<8x256xf32> -> vector<8x256xf32>
    %cst_69 = arith.constant 0.000000e+00 : f32
    %98 = vector.broadcast %cst_69 : f32 to vector<8x256xf32>
    %99 = vector.shape_cast %18 : vector<1x256xi1> to vector<1x256xi1>
    %100 = vector.broadcast %99 : vector<1x256xi1> to vector<8x256xi1>
    %101 = arith.select %100, %97, %98 : vector<8x256xi1>, vector<8x256xf32>
    %102 = arith.addf %92, %101 : vector<8x256xf32>
    %c0_70 = arith.constant 0 : index
    %c0_71 = arith.constant 0 : index
    %c33 = arith.constant 33 : index
    %103 = vector.load %arg12[%c0_70, %c0_71, %c33] : memref<1x24x290xbf16, #tpu.memory_space<vmem>>, vector<1x8x256xbf16>
    %104 = vector.shape_cast %103 : vector<1x8x256xbf16> to vector<8x256xbf16>
    %c7 = arith.constant 7 : index
    %c0_72 = arith.constant 0 : index
    %c0_73 = arith.constant 0 : index
    %105 = vector.load %arg4[%c7, %c0_72, %c0_73] : memref<9x8x8xbf16, #tpu.memory_space<vmem>>, vector<1x8x8xbf16>
    %106 = vector.shape_cast %105 : vector<1x8x8xbf16> to vector<8x8xbf16>
    %cst_74 = arith.constant dense<0.000000e+00> : vector<8x256xf32>
    %107 = tpu.matmul %106, %104, %cst_74 {dimension_numbers = #tpu.dot_dimension_numbers<[1], [0], [0], [1], [0, 0, 1, 1], [], []>} : vector<8x8xbf16>, vector<8x256xbf16>, vector<8x256xf32> -> vector<8x256xf32>
    %108 = arith.addf %102, %107 : vector<8x256xf32>
    %c0_75 = arith.constant 0 : index
    %c0_76 = arith.constant 0 : index
    %c34 = arith.constant 34 : index
    %109 = vector.load %arg12[%c0_75, %c0_76, %c34] : memref<1x24x290xbf16, #tpu.memory_space<vmem>>, vector<1x8x256xbf16>
    %110 = vector.shape_cast %109 : vector<1x8x256xbf16> to vector<8x256xbf16>
    %c8 = arith.constant 8 : index
    %c0_77 = arith.constant 0 : index
    %c0_78 = arith.constant 0 : index
    %111 = vector.load %arg4[%c8, %c0_77, %c0_78] : memref<9x8x8xbf16, #tpu.memory_space<vmem>>, vector<1x8x8xbf16>
    %112 = vector.shape_cast %111 : vector<1x8x8xbf16> to vector<8x8xbf16>
    %cst_79 = arith.constant dense<0.000000e+00> : vector<8x256xf32>
    %113 = tpu.matmul %112, %110, %cst_79 {dimension_numbers = #tpu.dot_dimension_numbers<[1], [0], [0], [1], [0, 0, 1, 1], [], []>} : vector<8x8xbf16>, vector<8x256xbf16>, vector<8x256xf32> -> vector<8x256xf32>
    %cst_80 = arith.constant 0.000000e+00 : f32
    %114 = vector.broadcast %cst_80 : f32 to vector<8x256xf32>
    %115 = vector.shape_cast %20 : vector<1x256xi1> to vector<1x256xi1>
    %116 = vector.broadcast %115 : vector<1x256xi1> to vector<8x256xi1>
    %117 = arith.select %116, %113, %114 : vector<8x256xi1>, vector<8x256xf32>
    %118 = arith.addf %108, %117 : vector<8x256xf32>
    %c0_81 = arith.constant 0 : index
    %c8_82 = arith.constant 8 : index
    %c0_83 = arith.constant 0 : index
    %119 = vector.load %arg11[%c0_81, %c8_82, %c0_83] : memref<1x32x256xf32, #tpu.memory_space<vmem>>, vector<1x8x256xf32>
    %120 = vector.shape_cast %119 : vector<1x8x256xf32> to vector<8x256xf32>
    %121 = vector.shape_cast %118 : vector<8x256xf32> to vector<1x8x256xf32>
    tpu.vector_store %arg11[%c0_81, %c8_82, %c0_83], %121 {strides = array<i32>} : memref<1x32x256xf32, #tpu.memory_space<vmem>>, vector<1x8x256xf32>,
    %c0_84 = arith.constant 0 : index
    %c0_85 = arith.constant 0 : index
    %122 = vector.load %arg5[%c0_84, %c0_85] : memref<16x1xf32, #tpu.memory_space<vmem>>, vector<16x1xf32>
    %c0_86 = arith.constant 0 : index
    %c0_87 = arith.constant 0 : index
    %123 = vector.load %arg6[%c0_86, %c0_87] : memref<16x1xf32, #tpu.memory_space<vmem>>, vector<16x1xf32>
    %c0_88 = arith.constant 0 : index
    %c0_89 = arith.constant 0 : index
    %c0_90 = arith.constant 0 : index
    %124 = vector.load %arg11[%c0_88, %c0_89, %c0_90] : memref<1x32x256xf32, #tpu.memory_space<vmem>>, vector<1x16x256xf32>
    %125 = vector.shape_cast %124 : vector<1x16x256xf32> to vector<16x256xf32>
    %126 = vector.broadcast %122 : vector<16x1xf32> to vector<16x256xf32>
    %127 = arith.mulf %125, %126 : vector<16x256xf32>
    %128 = vector.broadcast %123 : vector<16x1xf32> to vector<16x256xf32>
    %129 = arith.addf %127, %128 : vector<16x256xf32>
    %cst_91 = arith.constant 0.000000e+00 : f32
    %130 = vector.broadcast %cst_91 : f32 to vector<16x256xf32>
    %131 = arith.maximumf %129, %130 : vector<16x256xf32>
    %132 = arith.truncf %131 : vector<16x256xf32> to vector<16x256xbf16>
    %c0_92 = arith.constant 0 : index
    %c0_93 = arith.constant 0 : index
    %c17_94 = arith.constant 17 : index
    %133 = vector.load %arg12[%c0_92, %c0_93, %c17_94] : memref<1x24x290xbf16, #tpu.memory_space<vmem>>, vector<1x16x256xbf16>
    %134 = vector.shape_cast %133 : vector<1x16x256xbf16> to vector<16x256xbf16>
    %135 = vector.shape_cast %132 : vector<16x256xbf16> to vector<1x16x256xbf16>
    tpu.vector_store %arg12[%c0_92, %c0_93, %c17_94], %135 {strides = array<i32>} : memref<1x24x290xbf16, #tpu.memory_space<vmem>>, vector<1x16x256xbf16>,
    %cst_95 = arith.constant 0.000000e+00 : f32
    %136 = vector.broadcast %cst_95 : f32 to vector<8x256xf32>
    %c0_96 = arith.constant 0 : index
    %c0_97 = arith.constant 0 : index
    %c0_98 = arith.constant 0 : index
    %137 = vector.load %arg12[%c0_96, %c0_97, %c0_98] : memref<1x24x290xbf16, #tpu.memory_space<vmem>>, vector<1x16x256xbf16>
    %138 = vector.shape_cast %137 : vector<1x16x256xbf16> to vector<16x256xbf16>
    %c0_99 = arith.constant 0 : index
    %c0_100 = arith.constant 0 : index
    %c0_101 = arith.constant 0 : index
    %139 = vector.load %arg7[%c0_99, %c0_100, %c0_101] : memref<9x8x16xbf16, #tpu.memory_space<vmem>>, vector<1x8x16xbf16>
    %140 = vector.shape_cast %139 : vector<1x8x16xbf16> to vector<8x16xbf16>
    %cst_102 = arith.constant dense<0.000000e+00> : vector<8x256xf32>
    %141 = tpu.matmul %140, %138, %cst_102 {dimension_numbers = #tpu.dot_dimension_numbers<[1], [0], [0], [1], [0, 0, 1, 1], [], []>} : vector<8x16xbf16>, vector<16x256xbf16>, vector<8x256xf32> -> vector<8x256xf32>
    %cst_103 = arith.constant 0.000000e+00 : f32
    %142 = vector.broadcast %cst_103 : f32 to vector<8x256xf32>
    %143 = vector.shape_cast %18 : vector<1x256xi1> to vector<1x256xi1>
    %144 = vector.broadcast %143 : vector<1x256xi1> to vector<8x256xi1>
    %145 = arith.select %144, %141, %142 : vector<8x256xi1>, vector<8x256xf32>
    %146 = arith.addf %136, %145 : vector<8x256xf32>
    %c0_104 = arith.constant 0 : index
    %c0_105 = arith.constant 0 : index
    %c1_106 = arith.constant 1 : index
    %147 = vector.load %arg12[%c0_104, %c0_105, %c1_106] : memref<1x24x290xbf16, #tpu.memory_space<vmem>>, vector<1x16x256xbf16>
    %148 = vector.shape_cast %147 : vector<1x16x256xbf16> to vector<16x256xbf16>
    %c1_107 = arith.constant 1 : index
    %c0_108 = arith.constant 0 : index
    %c0_109 = arith.constant 0 : index
    %149 = vector.load %arg7[%c1_107, %c0_108, %c0_109] : memref<9x8x16xbf16, #tpu.memory_space<vmem>>, vector<1x8x16xbf16>
    %150 = vector.shape_cast %149 : vector<1x8x16xbf16> to vector<8x16xbf16>
    %cst_110 = arith.constant dense<0.000000e+00> : vector<8x256xf32>
    %151 = tpu.matmul %150, %148, %cst_110 {dimension_numbers = #tpu.dot_dimension_numbers<[1], [0], [0], [1], [0, 0, 1, 1], [], []>} : vector<8x16xbf16>, vector<16x256xbf16>, vector<8x256xf32> -> vector<8x256xf32>
    %152 = arith.addf %146, %151 : vector<8x256xf32>
    %c0_111 = arith.constant 0 : index
    %c0_112 = arith.constant 0 : index
    %c2_113 = arith.constant 2 : index
    %153 = vector.load %arg12[%c0_111, %c0_112, %c2_113] : memref<1x24x290xbf16, #tpu.memory_space<vmem>>, vector<1x16x256xbf16>
    %154 = vector.shape_cast %153 : vector<1x16x256xbf16> to vector<16x256xbf16>
    %c2_114 = arith.constant 2 : index
    %c0_115 = arith.constant 0 : index
    %c0_116 = arith.constant 0 : index
    %155 = vector.load %arg7[%c2_114, %c0_115, %c0_116] : memref<9x8x16xbf16, #tpu.memory_space<vmem>>, vector<1x8x16xbf16>
    %156 = vector.shape_cast %155 : vector<1x8x16xbf16> to vector<8x16xbf16>
    %cst_117 = arith.constant dense<0.000000e+00> : vector<8x256xf32>
    %157 = tpu.matmul %156, %154, %cst_117 {dimension_numbers = #tpu.dot_dimension_numbers<[1], [0], [0], [1], [0, 0, 1, 1], [], []>} : vector<8x16xbf16>, vector<16x256xbf16>, vector<8x256xf32> -> vector<8x256xf32>
    %cst_118 = arith.constant 0.000000e+00 : f32
    %158 = vector.broadcast %cst_118 : f32 to vector<8x256xf32>
    %159 = vector.shape_cast %20 : vector<1x256xi1> to vector<1x256xi1>
    %160 = vector.broadcast %159 : vector<1x256xi1> to vector<8x256xi1>
    %161 = arith.select %160, %157, %158 : vector<8x256xi1>, vector<8x256xf32>
    %162 = arith.addf %152, %161 : vector<8x256xf32>
    %c0_119 = arith.constant 0 : index
    %c0_120 = arith.constant 0 : index
    %c16_121 = arith.constant 16 : index
    %163 = vector.load %arg12[%c0_119, %c0_120, %c16_121] : memref<1x24x290xbf16, #tpu.memory_space<vmem>>, vector<1x16x256xbf16>
    %164 = vector.shape_cast %163 : vector<1x16x256xbf16> to vector<16x256xbf16>
    %c3_122 = arith.constant 3 : index
    %c0_123 = arith.constant 0 : index
    %c0_124 = arith.constant 0 : index
    %165 = vector.load %arg7[%c3_122, %c0_123, %c0_124] : memref<9x8x16xbf16, #tpu.memory_space<vmem>>, vector<1x8x16xbf16>
    %166 = vector.shape_cast %165 : vector<1x8x16xbf16> to vector<8x16xbf16>
    %cst_125 = arith.constant dense<0.000000e+00> : vector<8x256xf32>
    %167 = tpu.matmul %166, %164, %cst_125 {dimension_numbers = #tpu.dot_dimension_numbers<[1], [0], [0], [1], [0, 0, 1, 1], [], []>} : vector<8x16xbf16>, vector<16x256xbf16>, vector<8x256xf32> -> vector<8x256xf32>
    %cst_126 = arith.constant 0.000000e+00 : f32
    %168 = vector.broadcast %cst_126 : f32 to vector<8x256xf32>
    %169 = vector.shape_cast %18 : vector<1x256xi1> to vector<1x256xi1>
    %170 = vector.broadcast %169 : vector<1x256xi1> to vector<8x256xi1>
    %171 = arith.select %170, %167, %168 : vector<8x256xi1>, vector<8x256xf32>
    %172 = arith.addf %162, %171 : vector<8x256xf32>
    %c0_127 = arith.constant 0 : index
    %c0_128 = arith.constant 0 : index
    %c17_129 = arith.constant 17 : index
    %173 = vector.load %arg12[%c0_127, %c0_128, %c17_129] : memref<1x24x290xbf16, #tpu.memory_space<vmem>>, vector<1x16x256xbf16>
    %174 = vector.shape_cast %173 : vector<1x16x256xbf16> to vector<16x256xbf16>
    %c4_130 = arith.constant 4 : index
    %c0_131 = arith.constant 0 : index
    %c0_132 = arith.constant 0 : index
    %175 = vector.load %arg7[%c4_130, %c0_131, %c0_132] : memref<9x8x16xbf16, #tpu.memory_space<vmem>>, vector<1x8x16xbf16>
    %176 = vector.shape_cast %175 : vector<1x8x16xbf16> to vector<8x16xbf16>
    %cst_133 = arith.constant dense<0.000000e+00> : vector<8x256xf32>
    %177 = tpu.matmul %176, %174, %cst_133 {dimension_numbers = #tpu.dot_dimension_numbers<[1], [0], [0], [1], [0, 0, 1, 1], [], []>} : vector<8x16xbf16>, vector<16x256xbf16>, vector<8x256xf32> -> vector<8x256xf32>
    %178 = arith.addf %172, %177 : vector<8x256xf32>
    %c0_134 = arith.constant 0 : index
    %c0_135 = arith.constant 0 : index
    %c18_136 = arith.constant 18 : index
    %179 = vector.load %arg12[%c0_134, %c0_135, %c18_136] : memref<1x24x290xbf16, #tpu.memory_space<vmem>>, vector<1x16x256xbf16>
    %180 = vector.shape_cast %179 : vector<1x16x256xbf16> to vector<16x256xbf16>
    %c5_137 = arith.constant 5 : index
    %c0_138 = arith.constant 0 : index
    %c0_139 = arith.constant 0 : index
    %181 = vector.load %arg7[%c5_137, %c0_138, %c0_139] : memref<9x8x16xbf16, #tpu.memory_space<vmem>>, vector<1x8x16xbf16>
    %182 = vector.shape_cast %181 : vector<1x8x16xbf16> to vector<8x16xbf16>
    %cst_140 = arith.constant dense<0.000000e+00> : vector<8x256xf32>
    %183 = tpu.matmul %182, %180, %cst_140 {dimension_numbers = #tpu.dot_dimension_numbers<[1], [0], [0], [1], [0, 0, 1, 1], [], []>} : vector<8x16xbf16>, vector<16x256xbf16>, vector<8x256xf32> -> vector<8x256xf32>
    %cst_141 = arith.constant 0.000000e+00 : f32
    %184 = vector.broadcast %cst_141 : f32 to vector<8x256xf32>
    %185 = vector.shape_cast %20 : vector<1x256xi1> to vector<1x256xi1>
    %186 = vector.broadcast %185 : vector<1x256xi1> to vector<8x256xi1>
    %187 = arith.select %186, %183, %184 : vector<8x256xi1>, vector<8x256xf32>
    %188 = arith.addf %178, %187 : vector<8x256xf32>
    %c0_142 = arith.constant 0 : index
    %c0_143 = arith.constant 0 : index
    %c32_144 = arith.constant 32 : index
    %189 = vector.load %arg12[%c0_142, %c0_143, %c32_144] : memref<1x24x290xbf16, #tpu.memory_space<vmem>>, vector<1x16x256xbf16>
    %190 = vector.shape_cast %189 : vector<1x16x256xbf16> to vector<16x256xbf16>
    %c6_145 = arith.constant 6 : index
    %c0_146 = arith.constant 0 : index
    %c0_147 = arith.constant 0 : index
    %191 = vector.load %arg7[%c6_145, %c0_146, %c0_147] : memref<9x8x16xbf16, #tpu.memory_space<vmem>>, vector<1x8x16xbf16>
    %192 = vector.shape_cast %191 : vector<1x8x16xbf16> to vector<8x16xbf16>
    %cst_148 = arith.constant dense<0.000000e+00> : vector<8x256xf32>
    %193 = tpu.matmul %192, %190, %cst_148 {dimension_numbers = #tpu.dot_dimension_numbers<[1], [0], [0], [1], [0, 0, 1, 1], [], []>} : vector<8x16xbf16>, vector<16x256xbf16>, vector<8x256xf32> -> vector<8x256xf32>
    %cst_149 = arith.constant 0.000000e+00 : f32
    %194 = vector.broadcast %cst_149 : f32 to vector<8x256xf32>
    %195 = vector.shape_cast %18 : vector<1x256xi1> to vector<1x256xi1>
    %196 = vector.broadcast %195 : vector<1x256xi1> to vector<8x256xi1>
    %197 = arith.select %196, %193, %194 : vector<8x256xi1>, vector<8x256xf32>
    %198 = arith.addf %188, %197 : vector<8x256xf32>
    %c0_150 = arith.constant 0 : index
    %c0_151 = arith.constant 0 : index
    %c33_152 = arith.constant 33 : index
    %199 = vector.load %arg12[%c0_150, %c0_151, %c33_152] : memref<1x24x290xbf16, #tpu.memory_space<vmem>>, vector<1x16x256xbf16>
    %200 = vector.shape_cast %199 : vector<1x16x256xbf16> to vector<16x256xbf16>
    %c7_153 = arith.constant 7 : index
    %c0_154 = arith.constant 0 : index
    %c0_155 = arith.constant 0 : index
    %201 = vector.load %arg7[%c7_153, %c0_154, %c0_155] : memref<9x8x16xbf16, #tpu.memory_space<vmem>>, vector<1x8x16xbf16>
    %202 = vector.shape_cast %201 : vector<1x8x16xbf16> to vector<8x16xbf16>
    %cst_156 = arith.constant dense<0.000000e+00> : vector<8x256xf32>
    %203 = tpu.matmul %202, %200, %cst_156 {dimension_numbers = #tpu.dot_dimension_numbers<[1], [0], [0], [1], [0, 0, 1, 1], [], []>} : vector<8x16xbf16>, vector<16x256xbf16>, vector<8x256xf32> -> vector<8x256xf32>
    %204 = arith.addf %198, %203 : vector<8x256xf32>
    %c0_157 = arith.constant 0 : index
    %c0_158 = arith.constant 0 : index
    %c34_159 = arith.constant 34 : index
    %205 = vector.load %arg12[%c0_157, %c0_158, %c34_159] : memref<1x24x290xbf16, #tpu.memory_space<vmem>>, vector<1x16x256xbf16>
    %206 = vector.shape_cast %205 : vector<1x16x256xbf16> to vector<16x256xbf16>
    %c8_160 = arith.constant 8 : index
    %c0_161 = arith.constant 0 : index
    %c0_162 = arith.constant 0 : index
    %207 = vector.load %arg7[%c8_160, %c0_161, %c0_162] : memref<9x8x16xbf16, #tpu.memory_space<vmem>>, vector<1x8x16xbf16>
    %208 = vector.shape_cast %207 : vector<1x8x16xbf16> to vector<8x16xbf16>
    %cst_163 = arith.constant dense<0.000000e+00> : vector<8x256xf32>
    %209 = tpu.matmul %208, %206, %cst_163 {dimension_numbers = #tpu.dot_dimension_numbers<[1], [0], [0], [1], [0, 0, 1, 1], [], []>} : vector<8x16xbf16>, vector<16x256xbf16>, vector<8x256xf32> -> vector<8x256xf32>
    %cst_164 = arith.constant 0.000000e+00 : f32
    %210 = vector.broadcast %cst_164 : f32 to vector<8x256xf32>
    %211 = vector.shape_cast %20 : vector<1x256xi1> to vector<1x256xi1>
    %212 = vector.broadcast %211 : vector<1x256xi1> to vector<8x256xi1>
    %213 = arith.select %212, %209, %210 : vector<8x256xi1>, vector<8x256xf32>
    %214 = arith.addf %204, %213 : vector<8x256xf32>
    %c0_165 = arith.constant 0 : index
    %c16_166 = arith.constant 16 : index
    %c0_167 = arith.constant 0 : index
    %215 = vector.load %arg11[%c0_165, %c16_166, %c0_167] : memref<1x32x256xf32, #tpu.memory_space<vmem>>, vector<1x8x256xf32>
    %216 = vector.shape_cast %215 : vector<1x8x256xf32> to vector<8x256xf32>
    %217 = vector.shape_cast %214 : vector<8x256xf32> to vector<1x8x256xf32>
    tpu.vector_store %arg11[%c0_165, %c16_166, %c0_167], %217 {strides = array<i32>} : memref<1x32x256xf32, #tpu.memory_space<vmem>>, vector<1x8x256xf32>,
    %c0_168 = arith.constant 0 : index
    %c0_169 = arith.constant 0 : index
    %218 = vector.load %arg8[%c0_168, %c0_169] : memref<24x1xf32, #tpu.memory_space<vmem>>, vector<24x1xf32>
    %c0_170 = arith.constant 0 : index
    %c0_171 = arith.constant 0 : index
    %219 = vector.load %arg9[%c0_170, %c0_171] : memref<24x1xf32, #tpu.memory_space<vmem>>, vector<24x1xf32>
    %c0_172 = arith.constant 0 : index
    %c0_173 = arith.constant 0 : index
    %c0_174 = arith.constant 0 : index
    %220 = vector.load %arg11[%c0_172, %c0_173, %c0_174] : memref<1x32x256xf32, #tpu.memory_space<vmem>>, vector<1x24x256xf32>
    %221 = vector.shape_cast %220 : vector<1x24x256xf32> to vector<24x256xf32>
    %222 = vector.broadcast %218 : vector<24x1xf32> to vector<24x256xf32>
    %223 = arith.mulf %221, %222 : vector<24x256xf32>
    %224 = vector.broadcast %219 : vector<24x1xf32> to vector<24x256xf32>
    %225 = arith.addf %223, %224 : vector<24x256xf32>
    %cst_175 = arith.constant 0.000000e+00 : f32
    %226 = vector.broadcast %cst_175 : f32 to vector<24x256xf32>
    %227 = arith.maximumf %225, %226 : vector<24x256xf32>
    %228 = arith.truncf %227 : vector<24x256xf32> to vector<24x256xbf16>
    %c0_176 = arith.constant 0 : index
    %c0_177 = arith.constant 0 : index
    %c17_178 = arith.constant 17 : index
    %229 = vector.load %arg12[%c0_176, %c0_177, %c17_178] : memref<1x24x290xbf16, #tpu.memory_space<vmem>>, vector<1x24x256xbf16>
    %230 = vector.shape_cast %229 : vector<1x24x256xbf16> to vector<24x256xbf16>
    %231 = vector.shape_cast %228 : vector<24x256xbf16> to vector<1x24x256xbf16>
    tpu.vector_store %arg12[%c0_176, %c0_177, %c17_178], %231 {strides = array<i32>} : memref<1x24x290xbf16, #tpu.memory_space<vmem>>, vector<1x24x256xbf16>,
    %cst_179 = arith.constant 0.000000e+00 : f32
    %232 = vector.broadcast %cst_179 : f32 to vector<8x256xf32>
    %c0_180 = arith.constant 0 : index
    %c0_181 = arith.constant 0 : index
    %c0_182 = arith.constant 0 : index
    %233 = vector.load %arg12[%c0_180, %c0_181, %c0_182] : memref<1x24x290xbf16, #tpu.memory_space<vmem>>, vector<1x24x256xbf16>
    %234 = vector.shape_cast %233 : vector<1x24x256xbf16> to vector<24x256xbf16>
    %c0_183 = arith.constant 0 : index
    %c0_184 = arith.constant 0 : index
    %c0_185 = arith.constant 0 : index
    %235 = vector.load %arg10[%c0_183, %c0_184, %c0_185] : memref<9x8x24xbf16, #tpu.memory_space<vmem>>, vector<1x8x24xbf16>
    %236 = vector.shape_cast %235 : vector<1x8x24xbf16> to vector<8x24xbf16>
    %cst_186 = arith.constant dense<0.000000e+00> : vector<8x256xf32>
    %237 = tpu.matmul %236, %234, %cst_186 {dimension_numbers = #tpu.dot_dimension_numbers<[1], [0], [0], [1], [0, 0, 1, 1], [], []>} : vector<8x24xbf16>, vector<24x256xbf16>, vector<8x256xf32> -> vector<8x256xf32>
    %cst_187 = arith.constant 0.000000e+00 : f32
    %238 = vector.broadcast %cst_187 : f32 to vector<8x256xf32>
    %239 = vector.shape_cast %18 : vector<1x256xi1> to vector<1x256xi1>
    %240 = vector.broadcast %239 : vector<1x256xi1> to vector<8x256xi1>
    %241 = arith.select %240, %237, %238 : vector<8x256xi1>, vector<8x256xf32>
    %242 = arith.addf %232, %241 : vector<8x256xf32>
    %c0_188 = arith.constant 0 : index
    %c0_189 = arith.constant 0 : index
    %c1_190 = arith.constant 1 : index
    %243 = vector.load %arg12[%c0_188, %c0_189, %c1_190] : memref<1x24x290xbf16, #tpu.memory_space<vmem>>, vector<1x24x256xbf16>
    %244 = vector.shape_cast %243 : vector<1x24x256xbf16> to vector<24x256xbf16>
    %c1_191 = arith.constant 1 : index
    %c0_192 = arith.constant 0 : index
    %c0_193 = arith.constant 0 : index
    %245 = vector.load %arg10[%c1_191, %c0_192, %c0_193] : memref<9x8x24xbf16, #tpu.memory_space<vmem>>, vector<1x8x24xbf16>
    %246 = vector.shape_cast %245 : vector<1x8x24xbf16> to vector<8x24xbf16>
    %cst_194 = arith.constant dense<0.000000e+00> : vector<8x256xf32>
    %247 = tpu.matmul %246, %244, %cst_194 {dimension_numbers = #tpu.dot_dimension_numbers<[1], [0], [0], [1], [0, 0, 1, 1], [], []>} : vector<8x24xbf16>, vector<24x256xbf16>, vector<8x256xf32> -> vector<8x256xf32>
    %248 = arith.addf %242, %247 : vector<8x256xf32>
    %c0_195 = arith.constant 0 : index
    %c0_196 = arith.constant 0 : index
    %c2_197 = arith.constant 2 : index
    %249 = vector.load %arg12[%c0_195, %c0_196, %c2_197] : memref<1x24x290xbf16, #tpu.memory_space<vmem>>, vector<1x24x256xbf16>
    %250 = vector.shape_cast %249 : vector<1x24x256xbf16> to vector<24x256xbf16>
    %c2_198 = arith.constant 2 : index
    %c0_199 = arith.constant 0 : index
    %c0_200 = arith.constant 0 : index
    %251 = vector.load %arg10[%c2_198, %c0_199, %c0_200] : memref<9x8x24xbf16, #tpu.memory_space<vmem>>, vector<1x8x24xbf16>
    %252 = vector.shape_cast %251 : vector<1x8x24xbf16> to vector<8x24xbf16>
    %cst_201 = arith.constant dense<0.000000e+00> : vector<8x256xf32>
    %253 = tpu.matmul %252, %250, %cst_201 {dimension_numbers = #tpu.dot_dimension_numbers<[1], [0], [0], [1], [0, 0, 1, 1], [], []>} : vector<8x24xbf16>, vector<24x256xbf16>, vector<8x256xf32> -> vector<8x256xf32>
    %cst_202 = arith.constant 0.000000e+00 : f32
    %254 = vector.broadcast %cst_202 : f32 to vector<8x256xf32>
    %255 = vector.shape_cast %20 : vector<1x256xi1> to vector<1x256xi1>
    %256 = vector.broadcast %255 : vector<1x256xi1> to vector<8x256xi1>
    %257 = arith.select %256, %253, %254 : vector<8x256xi1>, vector<8x256xf32>
    %258 = arith.addf %248, %257 : vector<8x256xf32>
    %c0_203 = arith.constant 0 : index
    %c0_204 = arith.constant 0 : index
    %c16_205 = arith.constant 16 : index
    %259 = vector.load %arg12[%c0_203, %c0_204, %c16_205] : memref<1x24x290xbf16, #tpu.memory_space<vmem>>, vector<1x24x256xbf16>
    %260 = vector.shape_cast %259 : vector<1x24x256xbf16> to vector<24x256xbf16>
    %c3_206 = arith.constant 3 : index
    %c0_207 = arith.constant 0 : index
    %c0_208 = arith.constant 0 : index
    %261 = vector.load %arg10[%c3_206, %c0_207, %c0_208] : memref<9x8x24xbf16, #tpu.memory_space<vmem>>, vector<1x8x24xbf16>
    %262 = vector.shape_cast %261 : vector<1x8x24xbf16> to vector<8x24xbf16>
    %cst_209 = arith.constant dense<0.000000e+00> : vector<8x256xf32>
    %263 = tpu.matmul %262, %260, %cst_209 {dimension_numbers = #tpu.dot_dimension_numbers<[1], [0], [0], [1], [0, 0, 1, 1], [], []>} : vector<8x24xbf16>, vector<24x256xbf16>, vector<8x256xf32> -> vector<8x256xf32>
    %cst_210 = arith.constant 0.000000e+00 : f32
    %264 = vector.broadcast %cst_210 : f32 to vector<8x256xf32>
    %265 = vector.shape_cast %18 : vector<1x256xi1> to vector<1x256xi1>
    %266 = vector.broadcast %265 : vector<1x256xi1> to vector<8x256xi1>
    %267 = arith.select %266, %263, %264 : vector<8x256xi1>, vector<8x256xf32>
    %268 = arith.addf %258, %267 : vector<8x256xf32>
    %c0_211 = arith.constant 0 : index
    %c0_212 = arith.constant 0 : index
    %c17_213 = arith.constant 17 : index
    %269 = vector.load %arg12[%c0_211, %c0_212, %c17_213] : memref<1x24x290xbf16, #tpu.memory_space<vmem>>, vector<1x24x256xbf16>
    %270 = vector.shape_cast %269 : vector<1x24x256xbf16> to vector<24x256xbf16>
    %c4_214 = arith.constant 4 : index
    %c0_215 = arith.constant 0 : index
    %c0_216 = arith.constant 0 : index
    %271 = vector.load %arg10[%c4_214, %c0_215, %c0_216] : memref<9x8x24xbf16, #tpu.memory_space<vmem>>, vector<1x8x24xbf16>
    %272 = vector.shape_cast %271 : vector<1x8x24xbf16> to vector<8x24xbf16>
    %cst_217 = arith.constant dense<0.000000e+00> : vector<8x256xf32>
    %273 = tpu.matmul %272, %270, %cst_217 {dimension_numbers = #tpu.dot_dimension_numbers<[1], [0], [0], [1], [0, 0, 1, 1], [], []>} : vector<8x24xbf16>, vector<24x256xbf16>, vector<8x256xf32> -> vector<8x256xf32>
    %274 = arith.addf %268, %273 : vector<8x256xf32>
    %c0_218 = arith.constant 0 : index
    %c0_219 = arith.constant 0 : index
    %c18_220 = arith.constant 18 : index
    %275 = vector.load %arg12[%c0_218, %c0_219, %c18_220] : memref<1x24x290xbf16, #tpu.memory_space<vmem>>, vector<1x24x256xbf16>
    %276 = vector.shape_cast %275 : vector<1x24x256xbf16> to vector<24x256xbf16>
    %c5_221 = arith.constant 5 : index
    %c0_222 = arith.constant 0 : index
    %c0_223 = arith.constant 0 : index
    %277 = vector.load %arg10[%c5_221, %c0_222, %c0_223] : memref<9x8x24xbf16, #tpu.memory_space<vmem>>, vector<1x8x24xbf16>
    %278 = vector.shape_cast %277 : vector<1x8x24xbf16> to vector<8x24xbf16>
    %cst_224 = arith.constant dense<0.000000e+00> : vector<8x256xf32>
    %279 = tpu.matmul %278, %276, %cst_224 {dimension_numbers = #tpu.dot_dimension_numbers<[1], [0], [0], [1], [0, 0, 1, 1], [], []>} : vector<8x24xbf16>, vector<24x256xbf16>, vector<8x256xf32> -> vector<8x256xf32>
    %cst_225 = arith.constant 0.000000e+00 : f32
    %280 = vector.broadcast %cst_225 : f32 to vector<8x256xf32>
    %281 = vector.shape_cast %20 : vector<1x256xi1> to vector<1x256xi1>
    %282 = vector.broadcast %281 : vector<1x256xi1> to vector<8x256xi1>
    %283 = arith.select %282, %279, %280 : vector<8x256xi1>, vector<8x256xf32>
    %284 = arith.addf %274, %283 : vector<8x256xf32>
    %c0_226 = arith.constant 0 : index
    %c0_227 = arith.constant 0 : index
    %c32_228 = arith.constant 32 : index
    %285 = vector.load %arg12[%c0_226, %c0_227, %c32_228] : memref<1x24x290xbf16, #tpu.memory_space<vmem>>, vector<1x24x256xbf16>
    %286 = vector.shape_cast %285 : vector<1x24x256xbf16> to vector<24x256xbf16>
    %c6_229 = arith.constant 6 : index
    %c0_230 = arith.constant 0 : index
    %c0_231 = arith.constant 0 : index
    %287 = vector.load %arg10[%c6_229, %c0_230, %c0_231] : memref<9x8x24xbf16, #tpu.memory_space<vmem>>, vector<1x8x24xbf16>
    %288 = vector.shape_cast %287 : vector<1x8x24xbf16> to vector<8x24xbf16>
    %cst_232 = arith.constant dense<0.000000e+00> : vector<8x256xf32>
    %289 = tpu.matmul %288, %286, %cst_232 {dimension_numbers = #tpu.dot_dimension_numbers<[1], [0], [0], [1], [0, 0, 1, 1], [], []>} : vector<8x24xbf16>, vector<24x256xbf16>, vector<8x256xf32> -> vector<8x256xf32>
    %cst_233 = arith.constant 0.000000e+00 : f32
    %290 = vector.broadcast %cst_233 : f32 to vector<8x256xf32>
    %291 = vector.shape_cast %18 : vector<1x256xi1> to vector<1x256xi1>
    %292 = vector.broadcast %291 : vector<1x256xi1> to vector<8x256xi1>
    %293 = arith.select %292, %289, %290 : vector<8x256xi1>, vector<8x256xf32>
    %294 = arith.addf %284, %293 : vector<8x256xf32>
    %c0_234 = arith.constant 0 : index
    %c0_235 = arith.constant 0 : index
    %c33_236 = arith.constant 33 : index
    %295 = vector.load %arg12[%c0_234, %c0_235, %c33_236] : memref<1x24x290xbf16, #tpu.memory_space<vmem>>, vector<1x24x256xbf16>
    %296 = vector.shape_cast %295 : vector<1x24x256xbf16> to vector<24x256xbf16>
    %c7_237 = arith.constant 7 : index
    %c0_238 = arith.constant 0 : index
    %c0_239 = arith.constant 0 : index
    %297 = vector.load %arg10[%c7_237, %c0_238, %c0_239] : memref<9x8x24xbf16, #tpu.memory_space<vmem>>, vector<1x8x24xbf16>
    %298 = vector.shape_cast %297 : vector<1x8x24xbf16> to vector<8x24xbf16>
    %cst_240 = arith.constant dense<0.000000e+00> : vector<8x256xf32>
    %299 = tpu.matmul %298, %296, %cst_240 {dimension_numbers = #tpu.dot_dimension_numbers<[1], [0], [0], [1], [0, 0, 1, 1], [], []>} : vector<8x24xbf16>, vector<24x256xbf16>, vector<8x256xf32> -> vector<8x256xf32>
    %300 = arith.addf %294, %299 : vector<8x256xf32>
    %c0_241 = arith.constant 0 : index
    %c0_242 = arith.constant 0 : index
    %c34_243 = arith.constant 34 : index
    %301 = vector.load %arg12[%c0_241, %c0_242, %c34_243] : memref<1x24x290xbf16, #tpu.memory_space<vmem>>, vector<1x24x256xbf16>
    %302 = vector.shape_cast %301 : vector<1x24x256xbf16> to vector<24x256xbf16>
    %c8_244 = arith.constant 8 : index
    %c0_245 = arith.constant 0 : index
    %c0_246 = arith.constant 0 : index
    %303 = vector.load %arg10[%c8_244, %c0_245, %c0_246] : memref<9x8x24xbf16, #tpu.memory_space<vmem>>, vector<1x8x24xbf16>
    %304 = vector.shape_cast %303 : vector<1x8x24xbf16> to vector<8x24xbf16>
    %cst_247 = arith.constant dense<0.000000e+00> : vector<8x256xf32>
    %305 = tpu.matmul %304, %302, %cst_247 {dimension_numbers = #tpu.dot_dimension_numbers<[1], [0], [0], [1], [0, 0, 1, 1], [], []>} : vector<8x24xbf16>, vector<24x256xbf16>, vector<8x256xf32> -> vector<8x256xf32>
    %cst_248 = arith.constant 0.000000e+00 : f32
    %306 = vector.broadcast %cst_248 : f32 to vector<8x256xf32>
    %307 = vector.shape_cast %20 : vector<1x256xi1> to vector<1x256xi1>
    %308 = vector.broadcast %307 : vector<1x256xi1> to vector<8x256xi1>
    %309 = arith.select %308, %305, %306 : vector<8x256xi1>, vector<8x256xf32>
    %310 = arith.addf %300, %309 : vector<8x256xf32>
    %c0_249 = arith.constant 0 : index
    %c24 = arith.constant 24 : index
    %c0_250 = arith.constant 0 : index
    %311 = vector.load %arg11[%c0_249, %c24, %c0_250] : memref<1x32x256xf32, #tpu.memory_space<vmem>>, vector<1x8x256xf32>
    %312 = vector.shape_cast %311 : vector<1x8x256xf32> to vector<8x256xf32>
    %313 = vector.shape_cast %310 : vector<8x256xf32> to vector<1x8x256xf32>
    tpu.vector_store %arg11[%c0_249, %c24, %c0_250], %313 {strides = array<i32>} : memref<1x32x256xf32, #tpu.memory_space<vmem>>, vector<1x8x256xf32>,
    return
  }
  func.func @transform_0(%arg0: i32) -> (i32, i32, i32) {
    %c0_i32 = arith.constant 0 : i32
    %c0_i32_0 = arith.constant 0 : i32
    %c0_i32_1 = arith.constant 0 : i32
    return %arg0, %c0_i32, %c0_i32_0 : i32, i32, i32
  }
  func.func @transform_1(%arg0: i32) -> (i32, i32) {
    %c0_i32 = arith.constant 0 : i32
    %c0_i32_0 = arith.constant 0 : i32
    %c0_i32_1 = arith.constant 0 : i32
    return %c0_i32, %c0_i32_0 : i32, i32
  }
  func.func @transform_2(%arg0: i32) -> (i32, i32) {
    %c0_i32 = arith.constant 0 : i32
    %c0_i32_0 = arith.constant 0 : i32
    %c0_i32_1 = arith.constant 0 : i32
    return %c0_i32, %c0_i32_0 : i32, i32
  }
  func.func @transform_3(%arg0: i32) -> (i32, i32, i32) {
    %c0_i32 = arith.constant 0 : i32
    %c0_i32_0 = arith.constant 0 : i32
    %c0_i32_1 = arith.constant 0 : i32
    %c0_i32_2 = arith.constant 0 : i32
    return %c0_i32, %c0_i32_0, %c0_i32_1 : i32, i32, i32
  }
  func.func @transform_4(%arg0: i32) -> (i32, i32) {
    %c0_i32 = arith.constant 0 : i32
    %c0_i32_0 = arith.constant 0 : i32
    %c0_i32_1 = arith.constant 0 : i32
    return %c0_i32, %c0_i32_0 : i32, i32
  }
  func.func @transform_5(%arg0: i32) -> (i32, i32) {
    %c0_i32 = arith.constant 0 : i32
    %c0_i32_0 = arith.constant 0 : i32
    %c0_i32_1 = arith.constant 0 : i32
    return %c0_i32, %c0_i32_0 : i32, i32
  }
  func.func @transform_6(%arg0: i32) -> (i32, i32, i32) {
    %c0_i32 = arith.constant 0 : i32
    %c0_i32_0 = arith.constant 0 : i32
    %c0_i32_1 = arith.constant 0 : i32
    %c0_i32_2 = arith.constant 0 : i32
    return %c0_i32, %c0_i32_0, %c0_i32_1 : i32, i32, i32
  }
  func.func @transform_7(%arg0: i32) -> (i32, i32) {
    %c0_i32 = arith.constant 0 : i32
    %c0_i32_0 = arith.constant 0 : i32
    %c0_i32_1 = arith.constant 0 : i32
    return %c0_i32, %c0_i32_0 : i32, i32
  }
  func.func @transform_8(%arg0: i32) -> (i32, i32) {
    %c0_i32 = arith.constant 0 : i32
    %c0_i32_0 = arith.constant 0 : i32
    %c0_i32_1 = arith.constant 0 : i32
    return %c0_i32, %c0_i32_0 : i32, i32
  }
  func.func @transform_9(%arg0: i32) -> (i32, i32, i32) {
    %c0_i32 = arith.constant 0 : i32
    %c0_i32_0 = arith.constant 0 : i32
    %c0_i32_1 = arith.constant 0 : i32
    %c0_i32_2 = arith.constant 0 : i32
    return %c0_i32, %c0_i32_0, %c0_i32_1 : i32, i32, i32
  }
  func.func @transform_10(%arg0: i32) -> (i32, i32, i32) {
    %c0_i32 = arith.constant 0 : i32
    %c0_i32_0 = arith.constant 0 : i32
    %c0_i32_1 = arith.constant 0 : i32
    return %arg0, %c0_i32, %c0_i32_0 : i32, i32, i32
  }
}

</mosaic_0001>

<bundles_post_ra>
// kernel: tpu_custom_call.1
= control target key start
LH: loop header
LB: loop body
LE: loop exit
PB: predicated region body
PF: predicated region fallthrough
CT: control target
= control target key end

     0   :  { %s3548_s0 = inlined_call_operand.vmem [shape: f32[2,8,256], index: 0, kind: input, shape index: {}]   ;;  %s3549_s1 = inlined_call_operand.vmem [shape: f32[8,1], index: 1, kind: input, shape index: {}]   ;;  %s3550_s2 = inlined_call_operand.vmem [shape: f32[8,1], index: 2, kind: input, shape index: {}]   ;;  %s3551_s3 = inlined_call_operand.vmem [shape: bf16[9,8,8], index: 3, kind: input, shape index: {}]   ;;  %s3552_s4 = inlined_call_operand.vmem [shape: f32[16,1], index: 4, kind: input, shape index: {}]   ;;  %s3553_s5 = inlined_call_operand.vmem [shape: f32[16,1], index: 5, kind: input, shape index: {}]   ;;  %s3554_s6 = inlined_call_operand.vmem [shape: bf16[9,8,16], index: 6, kind: input, shape index: {}]   ;;  %s3555_s7 = inlined_call_operand.vmem [shape: f32[24,1], index: 7, kind: input, shape index: {}]   ;;  %s3556_s8 = inlined_call_operand.vmem [shape: f32[24,1], index: 8, kind: input, shape index: {}]   ;;  %s3557_s9 = inlined_call_operand.vmem [shape: bf16[9,8,24], index: 9, kind: input, shape index: {}]   ;;  %s3558_s10 = inlined_call_operand.hbm [shape: f32[2,32,256], index: 10, kind: output, shape index: {}]  }
   0x1   :  { %3580 = sst [smem:[#allocation7_spill]] %s3548_s0 }
   0x2   :  { %3581 = sst [smem:[#allocation8_spill]] %s3549_s1 }
   0x3   :  { %3582 = sst [smem:[#allocation9_spill]] %s3550_s2 }
   0x4   :  { %3583 = sst [smem:[#allocation10_spill]] %s3551_s3 }
   0x5   :  { %3584 = sst [smem:[#allocation11_spill]] %s3552_s4 }
   0x6   :  { %3585 = sst [smem:[#allocation12_spill]] %s3553_s5 }
   0x7   :  { %15 = vsyncpa [#allocation4], 0 }
   0x8   :  { %17 = vsyncpa [#allocation4 + $0x1], 0  ;;  %s2837_s13 = smov 0   ;;  %s2839_s14 = smov 0  }
   0x9   :  { %s2841_s15 = smov 0   ;;  %s2843_s16 = smov 0  }
   0xa LB: > { %s2858_s17 = sadd.s32 4294967295, %s2767_s16   ;;  %s2525_s18 = sadd.s32 4294967294, %s2767_s16   ;;  %s2767_s16 = sphi %s2843_s16, %s3639_s16   ;;  %s2763_s15 = sphi %s2841_s15, %s3638_s15   ;;  %s2759_s14 = sphi %s2839_s14, %s3637_s14   ;;  %s2755_s13 = sphi %s2837_s13, %s3636_s13  }
   0xb   : > { %s2862_s19 = sadd.s32 1, %s2767_s16   ;;  %s245_s20 = sadd.s32 1, %s2763_s15 }
   0xc   : > { %s242_s21 = ssub.s32 %s2767_s16, %s2862_s19  ;;  %p255_p0 = scmp.ne.s32.totalorder %s2763_s15, %s2759_s14 }
   0xd   : > { %p243_p1 = scmp.eq.s32.totalorder %s242_s21, 0  ;;  %p256_p2 = scmp.eq.s32.totalorder %s2858_s17, 1 }
   0xe   : > { %p261_p3 = scmp.ne.s32.totalorder %s2759_s14, %s2755_s13  ;;  %p262_p4 = scmp.eq.s32.totalorder %s2525_s18, 1 }
   0xf   : > { %s2873_s22 = scalar_select %p243_p1, %s2763_s15, %s245_s20  }
  0x10   : > { %p2875_p5 = por %p256_p2, %p255_p0  ;;  %p2879_p6 = por %p262_p4, %p261_p3 }
  0x11   : > { %3586 = sst [smem:[#allocation6_spill]] %s2873_s22  ;;  %p2528_p7 = scmp.ge.s32.totalorder %s2767_s16, 1 }
  0x12   : > { %p315_p8 = scmp.lt.s32.totalorder %s2767_s16, 3 }
  0x14   : > { %p316_p9 = pnand %p2528_p7, %p315_p8 }
  0x15   : > { %s3589_s1 = sld [smem:[#allocation8_spill]] (!%p316_p9)  ;;  %p353_p10 = scmp.lt.s32.totalorder (!%p316_p9), %s2858_s17, 1 }
  0x16   : > { %319 = sbr.rel (%p316_p9) target bundleno = 1708 (0x6ac), region = 60  ;;  %s3559_s27 = sand.u32 (!%p316_p9), 1, %s2759_s14  }
  0x17   : > { %s3590_s2 = sld [smem:[#allocation9_spill]] (!%p316_p9)  ;;  %s2529_s11 = sshll.u32 (!%p316_p9), %s3559_s27, 6 }
  0x18   : > { %s3591_s0 = sld [smem:[#allocation7_spill]] (!%p316_p9)  ;;  %s2907_s25 = scalar_lea.vmem (!%p316_p9), [#allocation3], %s2529_s11 }
  0x19   : > { %s3575_s26 = smov (!%p316_p9), 17   ;;  %s3570_s28 = smov (!%p316_p9), 126  }
  0x1a   : > { %s3564_s29 = smov (!%p316_p9), 127   ;;  %s3594_s3 = sld [smem:[#allocation10_spill]] (!%p316_p9) }
  0x1b   : > { %v402_v0 = vld [vmem:[%s3589_s1] sm:$0xff]  ;;  %v2769_v1 = vmov 0   ;;  %s354_s30 = scalar_select %p353_p10, %s2858_s17, 1  ;;  %vm390_vm0 = vcmask 134144   ;;  %vm394_vm1 = vcmask 273544   ;;  %vm436_vm2 = vcmask 1043592  }
  0x1c   : > { %2691 = vset.pattern.permute.xlu0 %v2769_v1  ;;  %491 = vmatprep.mubr.bf16.mxu0 %v2769_v1  ;;  %391 = vst.msk [vmem:[#allocation2] sm:$0xf] %vm390_vm0, %v2769_v1  ;;  %392 = vst.msk [vmem:[#allocation2 + $0xc] sm:$0xf] %vm390_vm0, %v2769_v1  ;;  %vm437_vm3 = vcmask 1047556   ;;  %vm432_vm4 = vcmask 138240  }
  0x1d   : > { %408 = vperm.xlu0 %2691, %v402_v0   ;;  %570 = vmatprep.mubr.bf16.mxu1 %v2769_v1  ;;  %v403_v2 = vld [vmem:[%s3590_s2] sm:$0xff]  ;;  %s2632_s12 = sshll.u32 %s354_s30, 4  ;;  %395 = vst.msk [vmem:[#allocation2 + $0x8] sm:$0xf] %vm394_vm1, %v2769_v1  ;;  %396 = vst.msk [vmem:[#allocation2 + $0x14] sm:$0xf] %vm394_vm1, %v2769_v1 }
  0x1e   : > { %2692 = vset.pattern.permute.xlu1 %v2769_v1  ;;  %s357_s21 = scalar_lea.vmem %s3591_s0, %s2632_s12  ;;  %393 = vst.msk [vmem:[#allocation2 + $0x18] sm:$0xf] %vm390_vm0, %v2769_v1  ;;  %vm2925_vm5 = vmor %vm437_vm3, %vm436_vm2  ;;  %vm3574_vm6 = vcmask 1043456   ;;  %vm448_vm7 = vcmask 64512   ;;  %s3562_s12 = smov 111   ;;  %vm526_vm8 = vcmask 1039360  }
  0x1f   : > { %v2903_v3 = vld [vmem:[%s357_s21] sm:$0xff]  ;;  %v2905_v4 = vld [vmem:[%s357_s21 + $0x8] sm:$0xff]  ;;  %397 = vst.msk [vmem:[#allocation2 + $0x20] sm:$0xf] %vm394_vm1, %v2769_v1  ;;  %s3560_s18 = smov 112   ;;  %s3568_s20 = smov 96  }
  0x20   : > { %400 = vst [vmem:[%s2907_s25] sm:$0xff] %v2903_v3  ;;  %401 = vst [vmem:[%s2907_s25 + $0x8] sm:$0xff] %v2905_v4  ;;  %v442_v23 = vld [vmem:[%s3594_s3] sm:$0xf]  ;;  %s3566_s21 = smov 110   ;;  %s3572_s27 = smov 95   ;;  %vm589_vm9 = vcmask 1031168  }
  0x21   : > { %415 = vperm.xlu0 %2691, %v403_v2   ;;  %s3577_s30 = smov 94   ;;  %s3595_s4 = sld [smem:[#allocation11_spill]]  ;;  %vm658_vm10 = vcmask 916480   ;;  %v2537_v41 = vld [vmem:[%s3594_s3 + $0x4] sm:$0xf]  ;;  %vm786_vm11 = vcmask 900096  }
  0x22   : > { %s3596_s5 = sld [smem:[#allocation12_spill]]  ;;  %v2543_v48 = vld [vmem:[%s3594_s3 + $0x8] sm:$0xf]  ;;  %vm723_vm12 = vcmask 908288   ;;  %v2546_v53 = vld [vmem:[%s3594_s3 + $0xc] sm:$0xf] }
  0x23   : > { %v2549_v60 = vld [vmem:[%s3594_s3 + $0x10] sm:$0xf]  ;;  %vm916_vm13 = vcmask 777216   ;;  %vm851_vm14 = vcmask 785408   ;;  %v2552_v2 = vld [vmem:[%s3594_s3 + $0x14] sm:$0xf] }
  0x24   : > { %vm3579_vm15 = vcmask 769024   ;;  %s3610_s11 = smov 110   ;;  %s3612_s22 = smov 17  }
  0x27   : > { %v1039_v24 = vld [vmem:[%s3595_s4 + $0x8] sm:$0xff]  ;;  %v1038_v25 = vld [vmem:[%s3595_s4] sm:$0xff] }
  0x28   : > { %v1041_v26 = vld [vmem:[%s3596_s5 + $0x8] sm:$0xff]  ;;  %v1040_v27 = vld [vmem:[%s3596_s5] sm:$0xff] }
  0x98   : > { %v409_v5 = vpop.permute.xlu0 %408 }
  0x99   : > { %v411_v6 = vmul.f32 %v409_v5, %v2903_v3  ;;  %v412_v7 = vmul.f32 %v409_v5, %v2905_v4 }
  0x9c   : > { %v416_v8 = vpop.permute.xlu0 %415 }
  0x9d   : > { %v418_v9 = vadd.f32 %v416_v8, %v411_v6  ;;  %v419_v10 = vadd.f32 %v416_v8, %v412_v7 }
  0x9f   : > { %v420_v11 = vmax.f32 %v418_v9, 0.0  ;;  %v421_v12 = vmax.f32 %v419_v10, 0.0 }
  0xa1   : > { %v2633_v13 = vpack.c.bf16 %v421_v12, %v420_v11  ;;  %v2555_v11 = vld [vmem:[%s3594_s3 + $0x18] sm:$0xf] }
  0xa3   : > { %429 = vrot.lane.b32.xlu1 %v2633_v13, %s3575_s26 }
 0x115   : > { %v430_v14 = vpop.permute.xlu1 %429 }
 0x116   : > { %v431_v16 = vrot.slane %v430_v14, 4 }
 0x118   : > { %v433_v17 = vsel %vm432_vm4, %v431_v16, %v430_v14  ;;  %440 = vst.msk [vmem:[#allocation2 + $0x8] sm:$0xf] %vm390_vm0, %v431_v16 }
 0x119   : > { %439 = vst.msk [vmem:[#allocation2] sm:$0xff] %vm2925_vm5, %v433_v17  ;;  %v2558_v17 = vld [vmem:[%s3594_s3 + $0x1c] sm:$0xf] }
 0x11f   : > { %v2693_v18 = vld [vmem:[#allocation2 + $0x8] ss:$0 sps:$4 sm:$0xff]  }
 0x120   : > { %v441_v19 = vld [vmem:[#allocation2] sm:$0xff]  ;;  %587 = vrot.lane.b32.xlu0 %v2693_v18, %s3570_s28  ;;  %524 = vrot.lane.b32.xlu1 %v2693_v18, %s3564_s29 }
 0x121   : > { %v2534_v20 = vcombine.high %v441_v19, %v441_v19  ;;  %v2533_v21 = vcombine.low %v441_v19, %v441_v19 }
 0x123   : > { %2535 = vmatprep.subr.msk.bf16.mxu0 %vm3574_vm6, %v2534_v20  ;;  %v454_v22 = vsel %vm3574_vm6, %v2533_v21, 0 }
 0x124   : > { %474 = vmatpush1.bf16.msra.mxu0 %v454_v22  ;;  %721 = vrot.lane.b32.xlu0 %v2693_v18, %s3562_s12 }
 0x125   : > { %656 = vrot.lane.b32.xlu1 %v2693_v18, %s3560_s18 }
 0x127   : > { %2536 = vmatmul.mubr.msk.bf16.vlgmr.msra.gmra.mxu0 %vm448_vm7, %v442_v23  ;;  %v2561_v23 = vld [vmem:[%s3594_s3 + $0x20] sm:$0xf] }
 0x128   : > { %633 = vmatprep.mubr.bf16.mxu0 %v2769_v1  ;;  %849 = vrot.lane.b32.xlu0 %v2693_v18, %s3568_s20 }
 0x129   : > { %784 = vrot.lane.b32.xlu1 %v2693_v18, %s3566_s21 }
 0x12c   : > { %522 = vrot.lane.b32.xlu0 %v2534_v20, %s3564_s29 }
 0x12d   : > { %914 = vrot.lane.b32.xlu1 %v2693_v18, %s3572_s27 }
 0x130   : > { %583 = vrot.lane.b32.xlu0 %v2533_v21, %s3570_s28 }
 0x131   : > { %520 = vrot.lane.b32.xlu1 %v2533_v21, %s3564_s29 }
 0x134   : > { %654 = vrot.lane.b32.xlu0 %v2534_v20, %s3560_s18 }
 0x135   : > { %585 = vrot.lane.b32.xlu1 %v2534_v20, %s3570_s28  ;;  %s3606_s28 = smov 127  }
 0x138   : > { %717 = vrot.lane.b32.xlu0 %v2533_v21, %s3562_s12 }
 0x139   : > { %652 = vrot.lane.b32.xlu1 %v2533_v21, %s3560_s18  ;;  %s3607_s18 = smov 111  }
 0x13c   : > { %782 = vrot.lane.b32.xlu0 %v2534_v20, %s3566_s21 }
 0x13d   : > { %719 = vrot.lane.b32.xlu1 %v2534_v20, %s3562_s12  ;;  %s3615_s12 = smov 94  }
 0x140   : > { %845 = vrot.lane.b32.xlu0 %v2533_v21, %s3568_s20 }
 0x141   : > { %780 = vrot.lane.b32.xlu1 %v2533_v21, %s3566_s21  ;;  %s3609_s21 = smov 96  }
 0x144   : > { %912 = vrot.lane.b32.xlu0 %v2534_v20, %s3572_s27 }
 0x145   : > { %847 = vrot.lane.b32.xlu1 %v2534_v20, %s3568_s20  ;;  %s3608_s20 = smov 112  }
 0x148   : > { %973 = vrot.lane.b32.xlu0 %v2533_v21, %s3577_s30 }
 0x149   : > { %910 = vrot.lane.b32.xlu1 %v2533_v21, %s3572_s27  ;;  %s3605_s27 = smov 126  }
 0x14c   : > { %977 = vrot.lane.b32.xlu0 %v2693_v18, %s3577_s30 }
 0x14d   : > { %975 = vrot.lane.b32.xlu1 %v2534_v20, %s3577_s30 }
 0x150   : > { %1053 = vperm.xlu0 %2691, %v1039_v24  }
 0x151   : > { %1048 = vperm.xlu1 %2692, %v1038_v25  }
 0x154   : > { %1067 = vperm.xlu0 %2691, %v1041_v26  }
 0x155   : > { %1062 = vperm.xlu1 %2692, %v1040_v27  }
 0x192   : > { %v588_v28 = vpop.permute.xlu0 %587  ;;  %v525_v29 = vpop.permute.xlu1 %524 }
 0x196   : > { %v722_v30 = vpop.permute.xlu0 %721 }
 0x197   : > { %v657_v31 = vpop.permute.xlu1 %656 }
 0x19a   : > { %v2976_v32 = vpop.permute.xlu0 %849 }
 0x19b   : > { %v785_v33 = vpop.permute.xlu1 %784 }
 0x19e   : > { %v523_v35 = vpop.permute.xlu0 %522 }
 0x19f   : > { %v915_v34 = vpop.permute.xlu1 %914  ;;  %v528_v36 = vsel %vm526_vm8, %v523_v35, %v525_v29 }
 0x1a0   : > { %2541 = vmatprep.subr.msk.bf16.mxu1 %vm3574_vm6, %v528_v36 }
 0x1a2   : > { %v584_v37 = vpop.permute.xlu0 %583 }
 0x1a3   : > { %v521_v38 = vpop.permute.xlu1 %520 }
 0x1a4   : > { %v527_v39 = vsel %vm526_vm8, %v521_v38, %v523_v35 }
 0x1a5   : > { %v533_v40 = vsel %vm3574_vm6, %v527_v39, 0 }
 0x1a6   : > { %553 = vmatpush1.bf16.msra.mxu1 %v533_v40  ;;  %v655_v42 = vpop.permute.xlu0 %654 }
 0x1a7   : > { %v586_v43 = vpop.permute.xlu1 %585  ;;  %v660_v46 = vsel %vm658_vm10, %v655_v42, %v657_v31 }
 0x1a8   : > { %v590_v44 = vsel %vm589_vm9, %v584_v37, %v586_v43  ;;  %v591_v45 = vsel %vm589_vm9, %v586_v43, %v588_v28  ;;  %2547 = vmatprep.subr.msk.bf16.mxu1 %vm3574_vm6, %v660_v46  ;;  %v359_v37 = vlaneseq }
 0x1a9   : > { %2542 = vmatmul.mubr.msk.bf16.vlgmr.msra.gmra.mxu1 %vm448_vm7, %v2537_v41  ;;  %2544 = vmatprep.subr.msk.bf16.mxu0 %vm3574_vm6, %v591_v45  ;;  %v596_v47 = vsel %vm3574_vm6, %v590_v44, 0 }
 0x1aa   : > { %616 = vmatpush1.bf16.msra.mxu0 %v596_v47  ;;  %v718_v49 = vpop.permute.xlu0 %717  ;;  %702 = vmatprep.mubr.bf16.mxu1 %v2769_v1  ;;  %v360_v38 = vand.u32 127, %v359_v37 }
 0x1ab   : > { %v653_v50 = vpop.permute.xlu1 %652 }
 0x1ac   : > { %v659_v51 = vsel %vm658_vm10, %v653_v50, %v655_v42  ;;  %v361_v40 = vadd.s32 128, %v360_v38  ;;  %v366_v42 = vand.u32 15, %v360_v38 }
 0x1ad   : > { %v665_v52 = vsel %vm3574_vm6, %v659_v51, 0  ;;  %2545 = vmatmul.mubr.msk.bf16.vlgmr.msra.gmra.mxu0 %vm448_vm7, %v2543_v48 }
 0x1ae   : > { %685 = vmatpush1.bf16.msra.mxu1 %v665_v52  ;;  %767 = vmatprep.mubr.bf16.mxu0 %v2769_v1  ;;  %v783_v54 = vpop.permute.xlu0 %782  ;;  %v373_v45 = vand.u32 15, %v361_v40  ;;  %vm3054_vm1 = vcmp.gt.s32.totalorder %v366_v42, 0  ;;  %vm3058_vm2 = vcmp.lt.s32.totalorder %v366_v42, 15 }
 0x1af   : > { %v720_v55 = vpop.permute.xlu1 %719  ;;  %v788_v56 = vsel %vm786_vm11, %v783_v54, %v785_v33 }
 0x1b0   : > { %v724_v57 = vsel %vm723_vm12, %v718_v49, %v720_v55  ;;  %v725_v58 = vsel %vm723_vm12, %v720_v55, %v722_v30  ;;  %2553 = vmatprep.subr.msk.bf16.mxu1 %vm3574_vm6, %v788_v56  ;;  %vm3062_vm3 = vcmp.gt.s32.totalorder %v373_v45, 0 }
 0x1b1   : > { %v730_v59 = vsel %vm3574_vm6, %v724_v57, 0  ;;  %2548 = vmatmul.mubr.msk.bf16.vlgmr.msra.gmra.mxu1 %vm448_vm7, %v2546_v53  ;;  %2550 = vmatprep.subr.msk.bf16.mxu0 %vm3574_vm6, %v725_v58 }
 0x1b2   : > { %750 = vmatpush1.bf16.msra.mxu0 %v730_v59  ;;  %v846_v61 = vpop.permute.xlu0 %845  ;;  %830 = vmatprep.mubr.bf16.mxu1 %v2769_v1 }
 0x1b3   : > { %v781_v62 = vpop.permute.xlu1 %780 }
 0x1b4   : > { %v787_v63 = vsel %vm786_vm11, %v781_v62, %v783_v54 }
 0x1b5   : > { %v793_v0 = vsel %vm3574_vm6, %v787_v63, 0  ;;  %2551 = vmatmul.mubr.msk.bf16.vlgmr.msra.gmra.mxu0 %vm448_vm7, %v2549_v60 }
 0x1b6   : > { %813 = vmatpush1.bf16.msra.mxu1 %v793_v0  ;;  %895 = vmatprep.mubr.bf16.mxu0 %v2769_v1  ;;  %v913_v5 = vpop.permute.xlu0 %912 }
 0x1b7   : > { %v848_v6 = vpop.permute.xlu1 %847  ;;  %v918_v7 = vsel %vm916_vm13, %v913_v5, %v915_v34 }
 0x1b8   : > { %v852_v8 = vsel %vm851_vm14, %v846_v61, %v848_v6  ;;  %v853_v9 = vsel %vm851_vm14, %v848_v6, %v2976_v32  ;;  %2559 = vmatprep.subr.msk.bf16.mxu1 %vm3574_vm6, %v918_v7 }
 0x1b9   : > { %v858_v10 = vsel %vm3574_vm6, %v852_v8, 0  ;;  %2554 = vmatmul.mubr.msk.bf16.vlgmr.msra.gmra.mxu1 %vm448_vm7, %v2552_v2  ;;  %2556 = vmatprep.subr.msk.bf16.mxu0 %vm3574_vm6, %v853_v9 }
 0x1ba   : > { %878 = vmatpush1.bf16.msra.mxu0 %v858_v10  ;;  %v974_v12 = vpop.permute.xlu0 %973  ;;  %960 = vmatprep.mubr.bf16.mxu1 %v2769_v1 }
 0x1bb   : > { %v911_v13 = vpop.permute.xlu1 %910 }
 0x1bc   : > { %v917_v14 = vsel %vm916_vm13, %v911_v13, %v913_v5 }
 0x1bd   : > { %v923_v16 = vsel %vm3574_vm6, %v917_v14, 0  ;;  %2557 = vmatmul.mubr.msk.bf16.vlgmr.msra.gmra.mxu0 %vm448_vm7, %v2555_v11 }
 0x1be   : > { %943 = vmatpush1.bf16.msra.mxu1 %v923_v16  ;;  %1023 = vmatprep.mubr.bf16.mxu0 %v2769_v1  ;;  %v978_v18 = vpop.permute.xlu0 %977 }
 0x1bf   : > { %v976_v19 = vpop.permute.xlu1 %975 }
 0x1c0   : > { %v980_v20 = vsel %vm3579_vm15, %v974_v12, %v976_v19  ;;  %v981_v21 = vsel %vm3579_vm15, %v976_v19, %v978_v18 }
 0x1c1   : > { %v986_v22 = vsel %vm3574_vm6, %v980_v20, 0  ;;  %2560 = vmatmul.mubr.msk.bf16.vlgmr.msra.gmra.mxu1 %vm448_vm7, %v2558_v17  ;;  %2562 = vmatprep.subr.msk.bf16.mxu0 %vm3574_vm6, %v981_v21  ;;  %vm1117_vm6 = vcmask 130048  }
 0x1c2   : > { %1006 = vmatpush1.bf16.msra.mxu0 %v986_v22  ;;  %1153 = vmatprep.mubr.bf16.mxu1 %v2769_v1 }
 0x1c5   : > { %2563 = vmatmul.mubr.msk.bf16.vlgmr.msra.gmra.mxu0 %vm448_vm7, %v2561_v23  ;;  %vm3066_vm7 = vcmp.lt.s32.totalorder %v373_v45, 15 }
 0x1c6   : > { %1230 = vmatprep.mubr.bf16.mxu0 %v2769_v1 }
 0x1cb   : > { %v1054_v37 = vpop.permute.xlu0 %1053 }
 0x1cc   : > { %v1049_v28 = vpop.permute.xlu1 %1048 }
 0x1cd   : > { %v1056_v29 = vmul.f32 %v1049_v28, %v2903_v3  ;;  %v1057_v30 = vmul.f32 %v1049_v28, %v2905_v4 }
 0x1d0   : > { %v1063_v31 = vpop.permute.xlu1 %1062 }
 0x1d1   : > { %v1070_v32 = vadd.f32 %v1063_v31, %v1056_v29  ;;  %v1071_v33 = vadd.f32 %v1063_v31, %v1057_v30 }
 0x1d3   : > { %v1074_v34 = vmax.f32 %v1070_v32, 0.0  ;;  %v1075_v35 = vmax.f32 %v1071_v33, 0.0 }
 0x1d5   : > { %v2634_v36 = vpack.c.bf16 %v1075_v35, %v1074_v34 }
 0x1d7   : > { %1088 = vrot.lane.b32.xlu1 %v2634_v36, %s3575_s26 }
 0x1e7   : > { %v493_v24 = vpop.f32.mrf.mxu0 }
 0x1e8   : > { %v504_v56 = vsel %vm3054_vm1, %v493_v24, 0.0 }
 0x1e9   : > { %v495_v25 = vpop.f32.mrf.mxu0 }
 0x1ea   : > { %v505_v61 = vsel %vm3062_vm3, %v495_v25, 0.0 }
 0x1eb   : > { %v497_v26 = vpop.f32.mrf.mxu0 }
 0x1ed   : > { %v498_v27 = vpop.f32.mrf.mxu0 }
 0x249   : > { %v1089_v27 = vpop.permute.xlu1 %1088 }
 0x24a   : > { %v1092_v32 = vrot.slane %v1089_v27, 4 }
 0x24c   : > { %v1094_v36 = vsel %vm432_vm4, %v1092_v32, %v1089_v27  ;;  %1101 = vst.msk [vmem:[#allocation2 + $0x8] sm:$0xf] %vm390_vm0, %v1092_v32 }
 0x24d   : > { %1100 = vst.msk [vmem:[#allocation2] sm:$0xff] %vm2925_vm5, %v1094_v36 }
 0x269   : > { %v572_v39 = vpop.f32.mrf.mxu1 }
 0x26a   : > { %v579_v58 = vadd.f32 %v572_v39, %v504_v56 }
 0x26b   : > { %v574_v41 = vpop.f32.mrf.mxu1 }
 0x26c   : > { %v580_v0 = vadd.f32 %v574_v41, %v505_v61 }
 0x26d   : > { %v576_v43 = vpop.f32.mrf.mxu1  ;;  %v635_v44 = vpop.f32.mrf.mxu0 }
 0x26e   : > { %v646_v57 = vsel %vm3058_vm2, %v635_v44, 0.0 }
 0x26f   : > { %v577_v46 = vpop.f32.mrf.mxu1  ;;  %v637_v47 = vpop.f32.mrf.mxu0  ;;  %v648_v2 = vadd.f32 %v646_v57, %v579_v58 }
 0x270   : > { %v647_v62 = vsel %vm3066_vm7, %v637_v47, 0.0 }
 0x271   : > { %v639_v50 = vpop.f32.mrf.mxu0  ;;  %v704_v51 = vpop.f32.mrf.mxu1  ;;  %v649_v8 = vadd.f32 %v647_v62, %v580_v0 }
 0x272   : > { %v711_v63 = vsel %vm3054_vm1, %v704_v51, 0.0 }
 0x273   : > { %v640_v54 = vpop.f32.mrf.mxu0  ;;  %v706_v55 = vpop.f32.mrf.mxu1  ;;  %v713_v9 = vadd.f32 %v711_v63, %v648_v2 }
 0x274   : > { %v712_v7 = vsel %vm3062_vm3, %v706_v55, 0.0  ;;  %v1068_v54 = vpop.permute.xlu0 %1067 }
 0x275   : > { %v708_v59 = vpop.f32.mrf.mxu1  ;;  %v769_v60 = vpop.f32.mrf.mxu0  ;;  %v714_v12 = vadd.f32 %v712_v7, %v649_v8  ;;  %v1106_v7 = vld [vmem:[%s3554_s6] sm:$0xf]  ;;  %v1664_v8 = vld [vmem:[%s3556_s8 + $0x10] sm:$0xff] }
 0x276   : > { %v776_v17 = vadd.f32 %v769_v60, %v713_v9  ;;  %v1661_v9 = vld [vmem:[%s3555_s7 + $0x10] sm:$0xff] }
 0x277   : > { %v709_v5 = vpop.f32.mrf.mxu1  ;;  %v771_v6 = vpop.f32.mrf.mxu0 }
 0x278   : > { %v777_v22 = vadd.f32 %v771_v6, %v714_v12  ;;  %v1663_v12 = vld [vmem:[%s3556_s8 + $0x8] sm:$0xff] }
 0x279   : > { %v773_v10 = vpop.f32.mrf.mxu0  ;;  %v832_v11 = vpop.f32.mrf.mxu1 }
 0x27a   : > { %v839_v16 = vsel %vm3058_vm2, %v832_v11, 0.0  ;;  %v1660_v10 = vld [vmem:[%s3555_s7 + $0x8] sm:$0xff]  ;;  %v1659_v11 = vld [vmem:[%s3555_s7] sm:$0xff] }
 0x27b   : > { %v774_v13 = vpop.f32.mrf.mxu0  ;;  %v834_v14 = vpop.f32.mrf.mxu1  ;;  %v841_v23 = vadd.f32 %v839_v16, %v776_v17 }
 0x27c   : > { %v840_v20 = vsel %vm3066_vm7, %v834_v14, 0.0  ;;  %v1662_v13 = vld [vmem:[%s3556_s8] sm:$0xff] }
 0x27d   : > { %v836_v18 = vpop.f32.mrf.mxu1  ;;  %v897_v19 = vpop.f32.mrf.mxu0  ;;  %v842_v28 = vadd.f32 %v840_v20, %v777_v22 }
 0x27e   : > { %v904_v21 = vsel %vm3054_vm1, %v897_v19, 0.0 }
 0x27f   : > { %v837_v24 = vpop.f32.mrf.mxu1  ;;  %v899_v25 = vpop.f32.mrf.mxu0  ;;  %v906_v29 = vadd.f32 %v904_v21, %v841_v23 }
 0x280   : > { %v905_v26 = vsel %vm3062_vm3, %v899_v25, 0.0 }
 0x281   : > { %v901_v30 = vpop.f32.mrf.mxu0  ;;  %v962_v31 = vpop.f32.mrf.mxu1  ;;  %v907_v33 = vadd.f32 %v905_v26, %v842_v28  ;;  %v2569_v28 = vld [vmem:[%s3554_s6 + $0x4] sm:$0xf] }
 0x282   : > { %v969_v38 = vadd.f32 %v962_v31, %v906_v29 }
 0x283   : > { %v902_v34 = vpop.f32.mrf.mxu0  ;;  %v964_v35 = vpop.f32.mrf.mxu1 }
 0x284   : > { %v970_v42 = vadd.f32 %v964_v35, %v907_v33  ;;  %v2574_v33 = vld [vmem:[%s3554_s6 + $0x8] sm:$0xf] }
 0x285   : > { %v966_v39 = vpop.f32.mrf.mxu1  ;;  %v1025_v40 = vpop.f32.mrf.mxu0 }
 0x286   : > { %v1032_v41 = vsel %vm3058_vm2, %v1025_v40, 0.0 }
 0x287   : > { %v3096_v43 = vadd.f32 %v1032_v41, %v969_v38  ;;  %v967_v44 = vpop.f32.mrf.mxu1  ;;  %v1027_v45 = vpop.f32.mrf.mxu0  ;;  %v2576_v38 = vld [vmem:[%s3554_s6 + $0xc] sm:$0xf] }
 0x288   : > { %v1033_v46 = vsel %vm3066_vm7, %v1027_v45, 0.0  ;;  %v2578_v44 = vld [vmem:[%s3554_s6 + $0x10] sm:$0xf] }
 0x289   : > { %1036 = vst [vmem:[%s2907_s25 + $0x10] sm:$0xff] %v3096_v43  ;;  %v3102_v47 = vadd.f32 %v1033_v46, %v970_v42  ;;  %v1029_v50 = vpop.f32.mrf.mxu0  ;;  %v1058_v51 = vmul.f32 %v1054_v37, %v3096_v43 }
 0x28b   : > { %1037 = vst [vmem:[%s2907_s25 + $0x18] sm:$0xff] %v3102_v47  ;;  %v1030_v55 = vpop.f32.mrf.mxu0  ;;  %v1059_v56 = vmul.f32 %v1054_v37, %v3102_v47  ;;  %v1072_v57 = vadd.f32 %v1068_v54, %v1058_v51 }
 0x28d   : > { %v1073_v58 = vadd.f32 %v1068_v54, %v1059_v56  ;;  %v1076_v59 = vmax.f32 %v1072_v57, 0.0  ;;  %v2580_v54 = vld [vmem:[%s3554_s6 + $0x14] sm:$0xf] }
 0x28f   : > { %v1077_v60 = vmax.f32 %v1073_v58, 0.0 }
 0x291   : > { %v2635_v61 = vpack.c.bf16 %v1077_v60, %v1076_v59  ;;  %v2582_v59 = vld [vmem:[%s3554_s6 + $0x18] sm:$0xf] }
 0x293   : > { %1090 = vrot.lane.b32.xlu0 %v2635_v61, %s3575_s26  ;;  %s3611_s26 = smov 95  }
 0x305   : > { %v1091_v62 = vpop.permute.xlu0 %1090 }
 0x306   : > { %v1093_v63 = vrot.slane %v1091_v62, 4 }
 0x308   : > { %v1095_v0 = vsel %vm432_vm4, %v1093_v63, %v1091_v62  ;;  %1103 = vst.msk [vmem:[#allocation2 + $0x14] sm:$0xf] %vm390_vm0, %v1093_v63  ;;  %v2584_v63 = vld [vmem:[%s3554_s6 + $0x1c] sm:$0xf] }
 0x309   : > { %1102 = vst.msk [vmem:[#allocation2 + $0xc] sm:$0xff] %vm2925_vm5, %v1095_v0 }
 0x30f   : > { %v2696_v2 = vld [vmem:[#allocation2 + $0x8] ss:$12 sps:$4 sm:$0xff]  }
 0x310   : > { %v2697_v5 = vld [vmem:[#allocation2 + $0x4] ss:$12 sps:$4 sm:$0xff]   ;;  %v2699_v6 = vld [vmem:[#allocation2] ss:$12 sps:$4 sm:$0xff]   ;;  %1247 = vrot.lane.b32.xlu1 %v2696_v2, %s3605_s27  ;;  %1189 = vrot.lane.b32.xlu0 %v2696_v2, %s3606_s28 }
 0x311   : > { %1135 = vmatprep.subr.bf16.mxu1 %v2697_v5 }
 0x312   : > { %1136 = vmatpush1.bf16.msra.mxu1 %v2699_v6 }
 0x314   : > { %1367 = vrot.lane.b32.xlu1 %v2696_v2, %s3607_s18  ;;  %1307 = vrot.lane.b32.xlu0 %v2696_v2, %s3608_s20 }
 0x315   : > { %2568 = vmatmul.mubr.msk.bf16.vlgmr.msra.gmra.mxu1 %vm1117_vm6, %v1106_v7  ;;  %v2586_v7 = vld [vmem:[%s3554_s6 + $0x20] sm:$0xf] }
 0x316   : > { %1288 = vmatprep.mubr.bf16.mxu1 %v2769_v1 }
 0x318   : > { %1485 = vrot.lane.b32.xlu1 %v2696_v2, %s3609_s21  ;;  %1425 = vrot.lane.b32.xlu0 %v2696_v2, %s3610_s11 }
 0x31c   : > { %1545 = vrot.lane.b32.xlu0 %v2696_v2, %s3611_s26  ;;  %1187 = vrot.lane.b32.xlu1 %v2697_v5, %s3606_s28 }
 0x320   : > { %1245 = vrot.lane.b32.xlu0 %v2697_v5, %s3605_s27  ;;  %1185 = vrot.lane.b32.xlu1 %v2699_v6, %s3606_s28 }
 0x324   : > { %1243 = vrot.lane.b32.xlu0 %v2699_v6, %s3605_s27  ;;  %1305 = vrot.lane.b32.xlu1 %v2697_v5, %s3608_s20 }
 0x328   : > { %1365 = vrot.lane.b32.xlu0 %v2697_v5, %s3607_s18  ;;  %1303 = vrot.lane.b32.xlu1 %v2699_v6, %s3608_s20 }
 0x32c   : > { %1363 = vrot.lane.b32.xlu0 %v2699_v6, %s3607_s18  ;;  %1423 = vrot.lane.b32.xlu1 %v2697_v5, %s3610_s11 }
 0x330   : > { %1483 = vrot.lane.b32.xlu0 %v2697_v5, %s3609_s21  ;;  %1421 = vrot.lane.b32.xlu1 %v2699_v6, %s3610_s11 }
 0x334   : > { %1481 = vrot.lane.b32.xlu0 %v2699_v6, %s3609_s21  ;;  %1543 = vrot.lane.b32.xlu1 %v2697_v5, %s3611_s26 }
 0x338   : > { %1601 = vrot.lane.b32.xlu0 %v2697_v5, %s3577_s30  ;;  %1541 = vrot.lane.b32.xlu1 %v2699_v6, %s3611_s26 }
 0x33c   : > { %1599 = vrot.lane.b32.xlu0 %v2699_v6, %s3577_s30  ;;  %1603 = vrot.lane.b32.xlu1 %v2696_v2, %s3577_s30 }
 0x340   : > { %1704 = vperm.xlu0 %2691, %v1664_v8   ;;  %1683 = vperm.xlu1 %2692, %v1661_v9  }
 0x344   : > { %1678 = vperm.xlu0 %2691, %v1660_v10   ;;  %1673 = vperm.xlu1 %2692, %v1659_v11  }
 0x348   : > { %1699 = vperm.xlu0 %2691, %v1663_v12   ;;  %1694 = vperm.xlu1 %2692, %v1662_v13  }
 0x382   : > { %v1248_v14 = vpop.permute.xlu1 %1247  ;;  %v1190_v16 = vpop.permute.xlu0 %1189 }
 0x386   : > { %v1368_v17 = vpop.permute.xlu1 %1367  ;;  %v1308_v18 = vpop.permute.xlu0 %1307 }
 0x38a   : > { %v1486_v19 = vpop.permute.xlu1 %1485  ;;  %v1426_v20 = vpop.permute.xlu0 %1425 }
 0x38e   : > { %v1546_v21 = vpop.permute.xlu0 %1545  ;;  %v1188_v22 = vpop.permute.xlu1 %1187 }
 0x38f   : > { %v1192_v23 = vsel %vm526_vm8, %v1188_v22, %v1190_v16 }
 0x390   : > { %1212 = vmatprep.subr.bf16.mxu0 %v1192_v23 }
 0x392   : > { %v1246_v24 = vpop.permute.xlu0 %1245  ;;  %v1186_v25 = vpop.permute.xlu1 %1185 }
 0x393   : > { %v1191_v26 = vsel %vm526_vm8, %v1186_v25, %v1188_v22  ;;  %v1250_v27 = vsel %vm589_vm9, %v1246_v24, %v1248_v14 }
 0x394   : > { %1213 = vmatpush1.bf16.msra.mxu0 %v1191_v26  ;;  %1270 = vmatprep.subr.bf16.mxu1 %v1250_v27 }
 0x396   : > { %v1244_v29 = vpop.permute.xlu0 %1243  ;;  %v1306_v30 = vpop.permute.xlu1 %1305 }
 0x397   : > { %v1249_v31 = vsel %vm589_vm9, %v1244_v29, %v1246_v24  ;;  %2573 = vmatmul.mubr.msk.bf16.vlgmr.msra.gmra.mxu0 %vm1117_vm6, %v2569_v28  ;;  %v1310_v32 = vsel %vm658_vm10, %v1306_v30, %v1308_v18 }
 0x398   : > { %1271 = vmatpush1.bf16.msra.mxu1 %v1249_v31  ;;  %1330 = vmatprep.subr.bf16.mxu0 %v1310_v32 }
 0x399   : > { %1348 = vmatprep.mubr.bf16.mxu0 %v2769_v1 }
 0x39a   : > { %v1366_v34 = vpop.permute.xlu0 %1365  ;;  %v1304_v35 = vpop.permute.xlu1 %1303 }
 0x39b   : > { %v1309_v36 = vsel %vm658_vm10, %v1304_v35, %v1306_v30  ;;  %2575 = vmatmul.mubr.msk.bf16.vlgmr.msra.gmra.mxu1 %vm1117_vm6, %v2574_v33  ;;  %v1370_v37 = vsel %vm723_vm12, %v1366_v34, %v1368_v17 }
 0x39c   : > { %1331 = vmatpush1.bf16.msra.mxu0 %v1309_v36  ;;  %1390 = vmatprep.subr.bf16.mxu1 %v1370_v37 }
 0x39d   : > { %1408 = vmatprep.mubr.bf16.mxu1 %v2769_v1 }
 0x39e   : > { %v1364_v39 = vpop.permute.xlu0 %1363  ;;  %v1424_v40 = vpop.permute.xlu1 %1423 }
 0x39f   : > { %v1369_v41 = vsel %vm723_vm12, %v1364_v39, %v1366_v34  ;;  %2577 = vmatmul.mubr.msk.bf16.vlgmr.msra.gmra.mxu0 %vm1117_vm6, %v2576_v38  ;;  %v1428_v42 = vsel %vm786_vm11, %v1424_v40, %v1426_v20 }
 0x3a0   : > { %1391 = vmatpush1.bf16.msra.mxu1 %v1369_v41  ;;  %1448 = vmatprep.subr.bf16.mxu0 %v1428_v42 }
 0x3a1   : > { %1466 = vmatprep.mubr.bf16.mxu0 %v2769_v1 }
 0x3a2   : > { %v1484_v45 = vpop.permute.xlu0 %1483  ;;  %v1422_v46 = vpop.permute.xlu1 %1421 }
 0x3a3   : > { %v1427_v50 = vsel %vm786_vm11, %v1422_v46, %v1424_v40  ;;  %2579 = vmatmul.mubr.msk.bf16.vlgmr.msra.gmra.mxu1 %vm1117_vm6, %v2578_v44  ;;  %v1488_v51 = vsel %vm851_vm14, %v1484_v45, %v1486_v19 }
 0x3a4   : > { %1449 = vmatpush1.bf16.msra.mxu0 %v1427_v50  ;;  %1508 = vmatprep.subr.bf16.mxu1 %v1488_v51 }
 0x3a5   : > { %1526 = vmatprep.mubr.bf16.mxu1 %v2769_v1 }
 0x3a6   : > { %v1482_v55 = vpop.permute.xlu0 %1481  ;;  %v1544_v56 = vpop.permute.xlu1 %1543 }
 0x3a7   : > { %v1487_v57 = vsel %vm851_vm14, %v1482_v55, %v1484_v45  ;;  %2581 = vmatmul.mubr.msk.bf16.vlgmr.msra.gmra.mxu0 %vm1117_vm6, %v2580_v54  ;;  %v1548_v58 = vsel %vm916_vm13, %v1544_v56, %v1546_v21 }
 0x3a8   : > { %1509 = vmatpush1.bf16.msra.mxu1 %v1487_v57  ;;  %1568 = vmatprep.subr.bf16.mxu0 %v1548_v58 }
 0x3a9   : > { %1586 = vmatprep.mubr.bf16.mxu0 %v2769_v1 }
 0x3aa   : > { %v1602_v60 = vpop.permute.xlu0 %1601  ;;  %v1542_v61 = vpop.permute.xlu1 %1541 }
 0x3ab   : > { %v1547_v62 = vsel %vm916_vm13, %v1542_v61, %v1544_v56  ;;  %2583 = vmatmul.mubr.msk.bf16.vlgmr.msra.gmra.mxu1 %vm1117_vm6, %v2582_v59 }
 0x3ac   : > { %1569 = vmatpush1.bf16.msra.mxu0 %v1547_v62  ;;  %1644 = vmatprep.mubr.bf16.mxu1 %v2769_v1 }
 0x3ae   : > { %v1600_v0 = vpop.permute.xlu0 %1599  ;;  %v1604_v2 = vpop.permute.xlu1 %1603 }
 0x3af   : > { %v1605_v5 = vsel %vm3579_vm15, %v1600_v0, %v1602_v60  ;;  %2585 = vmatmul.mubr.msk.bf16.vlgmr.msra.gmra.mxu0 %vm1117_vm6, %v2584_v63  ;;  %v1606_v6 = vsel %vm3579_vm15, %v1602_v60, %v1604_v2 }
 0x3b0   : > { %1626 = vmatprep.subr.bf16.mxu1 %v1606_v6  ;;  %1821 = vmatprep.mubr.bf16.mxu0 %v2769_v1 }
 0x3b1   : > { %1627 = vmatpush1.bf16.msra.mxu1 %v1605_v5 }
 0x3b4   : > { %2587 = vmatmul.mubr.msk.bf16.vlgmr.msra.gmra.mxu1 %vm1117_vm6, %v2586_v7  ;;  %vm3613_vm6 = vcmask 1043456  }
 0x3b5   : > { %1922 = vmatprep.mubr.bf16.mxu1 %v2769_v1  ;;  %vm3614_vm15 = vmmov %vm3613_vm6 }
 0x3bb   : > { %v3216_v8 = vpop.permute.xlu1 %1683  ;;  %v3221_v23 = vpop.permute.xlu0 %1704 }
 0x3bf   : > { %v1674_v9 = vpop.permute.xlu1 %1673  ;;  %v3223_v24 = vpop.permute.xlu0 %1678 }
 0x3c0   : > { %v1686_v10 = vmul.f32 %v1674_v9, %v2903_v3  ;;  %v1687_v11 = vmul.f32 %v1674_v9, %v2905_v4 }
 0x3c3   : > { %v1695_v12 = vpop.permute.xlu1 %1694  ;;  %v3225_v25 = vpop.permute.xlu0 %1699 }
 0x3c4   : > { %v1707_v13 = vadd.f32 %v1695_v12, %v1686_v10  ;;  %v1708_v14 = vadd.f32 %v1695_v12, %v1687_v11 }
 0x3c6   : > { %v1713_v16 = vmax.f32 %v1707_v13, 0.0  ;;  %v1714_v17 = vmax.f32 %v1708_v14, 0.0 }
 0x3c8   : > { %v2636_v18 = vpack.c.bf16 %v1714_v17, %v1713_v16 }
 0x3ca   : > { %1736 = vrot.lane.b32.xlu0 %v2636_v18, %s3612_s22 }
 0x3d5   : > { %v1155_v19 = vpop.f32.mrf.mxu1 }
 0x3d6   : > { %v1162_v37 = vsel %vm3054_vm1, %v1155_v19, 0.0 }
 0x3d7   : > { %v1157_v20 = vpop.f32.mrf.mxu1 }
 0x3d8   : > { %v1163_v42 = vsel %vm3062_vm3, %v1157_v20, 0.0 }
 0x3d9   : > { %v1159_v21 = vpop.f32.mrf.mxu1 }
 0x3db   : > { %v1160_v22 = vpop.f32.mrf.mxu1 }
 0x43c   : > { %v1737_v3 = vpop.permute.xlu0 %1736 }
 0x43d   : > { %v1742_v4 = vrot.slane %v1737_v3, 4 }
 0x43f   : > { %v1745_v26 = vsel %vm432_vm4, %v1742_v4, %v1737_v3  ;;  %1755 = vst.msk [vmem:[#allocation2 + $0x8] sm:$0xf] %vm390_vm0, %v1742_v4 }
 0x440   : > { %1754 = vst.msk [vmem:[#allocation2] sm:$0xff] %vm2925_vm5, %v1745_v26 }
 0x457   : > { %v1232_v27 = vpop.f32.mrf.mxu0 }
 0x458   : > { %v1239_v41 = vadd.f32 %v1232_v27, %v1162_v37 }
 0x459   : > { %v1234_v28 = vpop.f32.mrf.mxu0 }
 0x45a   : > { %v1240_v51 = vadd.f32 %v1234_v28, %v1163_v42 }
 0x45b   : > { %v1236_v29 = vpop.f32.mrf.mxu0  ;;  %v1290_v30 = vpop.f32.mrf.mxu1 }
 0x45c   : > { %v1297_v38 = vsel %vm3058_vm2, %v1290_v30, 0.0 }
 0x45d   : > { %v1237_v31 = vpop.f32.mrf.mxu0  ;;  %v1292_v32 = vpop.f32.mrf.mxu1  ;;  %v1299_v54 = vadd.f32 %v1297_v38, %v1239_v41 }
 0x45e   : > { %v1298_v44 = vsel %vm3066_vm7, %v1292_v32, 0.0 }
 0x45f   : > { %v1294_v33 = vpop.f32.mrf.mxu1  ;;  %v1350_v34 = vpop.f32.mrf.mxu0  ;;  %v1300_v58 = vadd.f32 %v1298_v44, %v1240_v51 }
 0x460   : > { %v1357_v45 = vsel %vm3054_vm1, %v1350_v34, 0.0 }
 0x461   : > { %v1295_v35 = vpop.f32.mrf.mxu1  ;;  %v1352_v36 = vpop.f32.mrf.mxu0  ;;  %v1359_v59 = vadd.f32 %v1357_v45, %v1299_v54 }
 0x462   : > { %v1358_v55 = vsel %vm3062_vm3, %v1352_v36, 0.0  ;;  %v1688_v35 = vmul.f32 %v3223_v24, %v3096_v43  ;;  %v1689_v36 = vmul.f32 %v3223_v24, %v3102_v47 }
 0x463   : > { %v1354_v39 = vpop.f32.mrf.mxu0  ;;  %v1410_v40 = vpop.f32.mrf.mxu1  ;;  %v1360_v62 = vadd.f32 %v1358_v55, %v1300_v58 }
 0x464   : > { %v1417_v5 = vadd.f32 %v1410_v40, %v1359_v59  ;;  %v1709_v40 = vadd.f32 %v3225_v25, %v1688_v35  ;;  %v1710_v41 = vadd.f32 %v3225_v25, %v1689_v36 }
 0x465   : > { %v1355_v46 = vpop.f32.mrf.mxu0  ;;  %v1412_v50 = vpop.f32.mrf.mxu1 }
 0x466   : > { %v1418_v11 = vadd.f32 %v1412_v50, %v1360_v62  ;;  %v1715_v46 = vmax.f32 %v1709_v40, 0.0  ;;  %v1716_v50 = vmax.f32 %v1710_v41, 0.0  ;;  %v1763_v62 = vld [vmem:[%s3557_s9] sm:$0xf] }
 0x467   : > { %v1414_v56 = vpop.f32.mrf.mxu1  ;;  %v1468_v57 = vpop.f32.mrf.mxu0 }
 0x468   : > { %v1475_v63 = vsel %vm3058_vm2, %v1468_v57, 0.0  ;;  %v2637_v47 = vpack.c.bf16 %v1716_v50, %v1715_v46 }
 0x469   : > { %v1415_v60 = vpop.f32.mrf.mxu1  ;;  %v1470_v61 = vpop.f32.mrf.mxu0  ;;  %v1477_v12 = vadd.f32 %v1475_v63, %v1417_v5 }
 0x46a   : > { %v1476_v6 = vsel %vm3066_vm7, %v1470_v61, 0.0 }
 0x46b   : > { %v1472_v0 = vpop.f32.mrf.mxu0  ;;  %v1528_v2 = vpop.f32.mrf.mxu1  ;;  %v1478_v17 = vadd.f32 %v1476_v6, %v1418_v11 }
 0x46c   : > { %v1535_v7 = vsel %vm3054_vm1, %v1528_v2, 0.0 }
 0x46d   : > { %v1473_v9 = vpop.f32.mrf.mxu0  ;;  %v1530_v10 = vpop.f32.mrf.mxu1  ;;  %v1537_v18 = vadd.f32 %v1535_v7, %v1477_v12 }
 0x46e   : > { %v1536_v13 = vsel %vm3062_vm3, %v1530_v10, 0.0 }
 0x46f   : > { %v1532_v14 = vpop.f32.mrf.mxu1  ;;  %v1588_v16 = vpop.f32.mrf.mxu0  ;;  %v1538_v21 = vadd.f32 %v1536_v13, %v1478_v17 }
 0x470   : > { %v1595_v3 = vadd.f32 %v1588_v16, %v1537_v18 }
 0x471   : > { %v1533_v19 = vpop.f32.mrf.mxu1  ;;  %v1590_v20 = vpop.f32.mrf.mxu0 }
 0x472   : > { %v1596_v28 = vadd.f32 %v1590_v20, %v1538_v21 }
 0x473   : > { %v1592_v22 = vpop.f32.mrf.mxu0 }
 0x474   : > { %v1646_v4 = vpop.f32.mrf.mxu1 }
 0x475   : > { %v1653_v26 = vsel %vm3058_vm2, %v1646_v4, 0.0  ;;  %v1593_v27 = vpop.f32.mrf.mxu0 }
 0x476   : > { %v1655_v29 = vadd.f32 %v1653_v26, %v1595_v3  ;;  %v1648_v30 = vpop.f32.mrf.mxu1 }
 0x477   : > { %v1654_v31 = vsel %vm3066_vm7, %v1648_v30, 0.0 }
 0x478   : > { %1657 = vst [vmem:[%s2907_s25 + $0x20] sm:$0xff] %v1655_v29  ;;  %v1656_v32 = vadd.f32 %v1654_v31, %v1596_v28  ;;  %v1650_v33 = vpop.f32.mrf.mxu1  ;;  %v1690_v34 = vmul.f32 %v3216_v8, %v1655_v29 }
 0x47a   : > { %1658 = vst [vmem:[%s2907_s25 + $0x28] sm:$0xff] %v1656_v32  ;;  %v1651_v37 = vpop.f32.mrf.mxu1  ;;  %v1691_v38 = vmul.f32 %v3216_v8, %v1656_v32  ;;  %v1711_v39 = vadd.f32 %v3221_v23, %v1690_v34 }
 0x47c   : > { %v1712_v42 = vadd.f32 %v3221_v23, %v1691_v38  ;;  %v1717_v44 = vmax.f32 %v1711_v39, 0.0 }
 0x47e   : > { %v1718_v45 = vmax.f32 %v1712_v42, 0.0 }
 0x480   : > { %v2638_v43 = vpack.c.bf16 %v1718_v45, %v1717_v44 }
 0x482   : > { %1740 = vrot.lane.b32.xlu1 %v2638_v43, %s3612_s22 }
 0x486   : > { %1738 = vrot.lane.b32.xlu1 %v2637_v47, %s3612_s22 }
 0x4f4   : > { %v1741_v24 = vpop.permute.xlu1 %1740 }
 0x4f5   : > { %v1744_v8 = vrot.slane %v1741_v24, 4 }
 0x4f7   : > { %v1747_v51 = vsel %vm432_vm4, %v1744_v8, %v1741_v24  ;;  %1759 = vst.msk [vmem:[#allocation2 + $0x20] sm:$0xf] %vm390_vm0, %v1744_v8  ;;  %v2597_v8 = vld [vmem:[%s3557_s9 + $0x4] sm:$0xf] }
 0x4f8   : > { %1758 = vst.msk [vmem:[#allocation2 + $0x18] sm:$0xff] %vm2925_vm5, %v1747_v51  ;;  %v1739_v23 = vpop.permute.xlu1 %1738 }
 0x4f9   : > { %v1743_v25 = vrot.slane %v1739_v23, 4 }
 0x4fb   : > { %v1746_v54 = vsel %vm432_vm4, %v1743_v25, %v1739_v23  ;;  %1757 = vst.msk [vmem:[#allocation2 + $0x14] sm:$0xf] %vm390_vm0, %v1743_v25  ;;  %vm1779_vm0 = vcmask 195584   ;;  %vm3616_vm4 = vmmov %vm3613_vm6 }
 0x4fc   : > { %1756 = vst.msk [vmem:[#allocation2 + $0xc] sm:$0xff] %vm2925_vm5, %v1746_v54  ;;  %vm3617_vm5 = vmmov %vm3616_vm4 }
 0x4fe   : > { %v2706_v15 = vld [vmem:[#allocation2 + $0x20] ss:$0 sps:$4 sm:$0xff]  }
 0x4ff   : > { %v1762_v55 = vld [vmem:[#allocation2 + $0x18] sm:$0xff] }
 0x500   : > { %v2594_v56 = vcombine.high %v1762_v55, %v1762_v55  ;;  %v2593_v57 = vcombine.low %v1762_v55, %v1762_v55 }
 0x502   : > { %2595 = vmatprep.subr.msk.bf16.mxu0 %vm3613_vm6, %v2594_v56  ;;  %v1784_v58 = vsel %vm3614_vm15, %v2593_v57, 0  ;;  %v2702_v59 = vld [vmem:[#allocation2 + $0x8] ss:$12 sps:$4 sm:$0xff]   ;;  %vm3618_vm15 = vmmov %vm3616_vm4 }
 0x503   : > { %1802 = vmatpush1.bf16.msra.mxu0 %v1784_v58  ;;  %v2703_v60 = vld [vmem:[#allocation2 + $0x4] ss:$12 sps:$4 sm:$0xff]   ;;  %1867 = vrot.lane.b32.xlu1 %v2702_v59, %s3606_s28  ;;  %v2705_v61 = vld [vmem:[#allocation2] ss:$12 sps:$4 sm:$0xff]   ;;  %vm3619_vm6 = vmmov %vm3616_vm4 }
 0x504   : > { %1865 = vrot.lane.b32.xlu0 %v2703_v60, %s3606_s28  ;;  %1803 = vmatprep.subr.bf16.mxu0 %v2703_v60 }
 0x507   : > { %1804 = vmatpush1.bf16.msra.mxu0 %v2705_v61  ;;  %1937 = vrot.lane.b32.xlu1 %v2703_v60, %s3605_s27 }
 0x508   : > { %1863 = vrot.lane.b32.xlu0 %v2705_v61, %s3606_s28 }
 0x50a   : > { %2596 = vmatmul.mubr.msk.bf16.vlgmr.msra.gmra.mxu0 %vm1779_vm0, %v1763_v62 }
 0x50b   : > { %1935 = vrot.lane.b32.xlu1 %v2705_v61, %s3605_s27  ;;  %1994 = vmatprep.mubr.bf16.mxu0 %v2769_v1 }
 0x50c   : > { %1939 = vrot.lane.b32.xlu0 %v2702_v59, %s3605_s27 }
 0x50f   : > { %2013 = vrot.lane.b32.xlu1 %v2702_v59, %s3608_s20 }
 0x510   : > { %2011 = vrot.lane.b32.xlu0 %v2703_v60, %s3608_s20 }
 0x513   : > { %2085 = vrot.lane.b32.xlu1 %v2703_v60, %s3607_s18 }
 0x514   : > { %2009 = vrot.lane.b32.xlu0 %v2705_v61, %s3608_s20 }
 0x517   : > { %2083 = vrot.lane.b32.xlu1 %v2705_v61, %s3607_s18 }
 0x518   : > { %2087 = vrot.lane.b32.xlu0 %v2702_v59, %s3607_s18 }
 0x51b   : > { %2159 = vrot.lane.b32.xlu1 %v2702_v59, %s3610_s11 }
 0x51c   : > { %2157 = vrot.lane.b32.xlu0 %v2703_v60, %s3610_s11 }
 0x51f   : > { %2231 = vrot.lane.b32.xlu1 %v2703_v60, %s3609_s21 }
 0x520   : > { %2155 = vrot.lane.b32.xlu0 %v2705_v61, %s3610_s11 }
 0x523   : > { %2229 = vrot.lane.b32.xlu1 %v2705_v61, %s3609_s21 }
 0x524   : > { %2233 = vrot.lane.b32.xlu0 %v2702_v59, %s3609_s21 }
 0x527   : > { %2307 = vrot.lane.b32.xlu1 %v2702_v59, %s3611_s26 }
 0x528   : > { %2305 = vrot.lane.b32.xlu0 %v2703_v60, %s3611_s26 }
 0x52b   : > { %1945 = vrot.lane.b32.xlu1 %v2706_v15, %s3605_s27 }
 0x52c   : > { %2303 = vrot.lane.b32.xlu0 %v2705_v61, %s3611_s26 }
 0x52f   : > { %2093 = vrot.lane.b32.xlu1 %v2706_v15, %s3607_s18 }
 0x530   : > { %1873 = vrot.lane.b32.xlu0 %v2706_v15, %s3606_s28 }
 0x533   : > { %2239 = vrot.lane.b32.xlu1 %v2706_v15, %s3609_s21 }
 0x534   : > { %2019 = vrot.lane.b32.xlu0 %v2706_v15, %s3608_s20 }
 0x537   : > { %2385 = vrot.lane.b32.xlu1 %v2706_v15, %s3615_s12 }
 0x538   : > { %2165 = vrot.lane.b32.xlu0 %v2706_v15, %s3610_s11 }
 0x53b   : > { %1871 = vrot.lane.b32.xlu1 %v2594_v56, %s3606_s28 }
 0x53c   : > { %2313 = vrot.lane.b32.xlu0 %v2706_v15, %s3611_s26 }
 0x53f   : > { %1941 = vrot.lane.b32.xlu1 %v2593_v57, %s3605_s27 }
 0x540   : > { %1869 = vrot.lane.b32.xlu0 %v2593_v57, %s3606_s28 }
 0x543   : > { %2017 = vrot.lane.b32.xlu1 %v2594_v56, %s3608_s20 }
 0x544   : > { %1943 = vrot.lane.b32.xlu0 %v2594_v56, %s3605_s27 }
 0x547   : > { %2089 = vrot.lane.b32.xlu1 %v2593_v57, %s3607_s18 }
 0x548   : > { %2015 = vrot.lane.b32.xlu0 %v2593_v57, %s3608_s20 }
 0x54b   : > { %2163 = vrot.lane.b32.xlu1 %v2594_v56, %s3610_s11 }
 0x54c   : > { %2091 = vrot.lane.b32.xlu0 %v2594_v56, %s3607_s18 }
 0x54f   : > { %2235 = vrot.lane.b32.xlu1 %v2593_v57, %s3609_s21 }
 0x550   : > { %2161 = vrot.lane.b32.xlu0 %v2593_v57, %s3610_s11  ;;  %s2779_s11 = smov [#allocation3]  }
 0x551   : > { %s2711_s0 = sshll.u32 %s2779_s11, 4  ;;  %s2712_s0 = int_to_ptr.vmem [resolvable:$false] %s2711_s0 }
 0x552   : > { %s2713_s1 = scalar_lea.vmem %s2712_s0, 2048 }
 0x553   : > { %2311 = vrot.lane.b32.xlu1 %v2594_v56, %s3611_s26 }
 0x554   : > { %2237 = vrot.lane.b32.xlu0 %v2594_v56, %s3609_s21 }
 0x557   : > { %2381 = vrot.lane.b32.xlu1 %v2593_v57, %s3615_s12 }
 0x558   : > { %2309 = vrot.lane.b32.xlu0 %v2593_v57, %s3611_s26  ;;  %v2606_v57 = vld [vmem:[%s3557_s9 + $0x8] sm:$0xf]  ;;  %s2463_s26 = sshll.u32 %s2907_s25, 4  ;;  %s3502_s26 = int_to_ptr.vmem [resolvable:$true] %s2463_s26 }
 0x559   : > { %s2707_s21 = scalar_lea.vmem %s3502_s26, 1024  ;;  %p2714_p0 = scmp.lt.s32.totalorder %s3502_s26, %s2712_s0 }
 0x55a   : > { %p2708_p11 = scmp.ne.s32.totalorder %s3502_s26, %s2707_s21  ;;  %p2715_p1 = scmp.lt.s32.totalorder %s2713_s1, %s2707_s21 }
 0x55b   : > { %2377 = vrot.lane.b32.xlu1 %v2703_v60, %s3615_s12 }
 0x55c   : > { %2383 = vrot.lane.b32.xlu0 %v2594_v56, %s3615_s12  ;;  %p2709_p12 = pnand %p2708_p11, %p2875_p5  ;;  %p2716_p2 = por %p2715_p1, %p2714_p0 }
 0x55e   : > { %p2710_p13 = pneg %p2709_p12 }
 0x55f   : > { %2375 = vrot.lane.b32.xlu1 %v2705_v61, %s3615_s12 }
 0x560   : > { %2379 = vrot.lane.b32.xlu0 %v2702_v59, %s3615_s12  ;;  %s2639_s12 = sshll.u32 %s2858_s17, 10  ;;  %s3634_s17 = sand.u32 1, %s2759_s14  }
 0x561   : > { %s3500_s18 = scalar_lea.hbm %s3558_s10, %s2639_s12  ;;  %s3508_s20 = scalar_lea.sflag [#allocation4], %s3634_s17 }
 0x562   : > { %p2717_p3 = pnand %p2716_p2, %p2710_p13 }
 0x575   : > { %v1868_v63 = vpop.permute.xlu1 %1867 }
 0x576   : > { %v1866_v0 = vpop.permute.xlu0 %1865 }
 0x577   : > { %v1876_v41 = vsel %vm526_vm8, %v1866_v0, %v1868_v63 }
 0x579   : > { %v1938_v2 = vpop.permute.xlu1 %1937 }
 0x57a   : > { %v1864_v5 = vpop.permute.xlu0 %1863 }
 0x57b   : > { %v1875_v46 = vsel %vm526_vm8, %v1864_v5, %v1866_v0 }
 0x57d   : > { %v1936_v6 = vpop.permute.xlu1 %1935 }
 0x57e   : > { %v1940_v7 = vpop.permute.xlu0 %1939  ;;  %v1947_v25 = vsel %vm589_vm9, %v1936_v6, %v1938_v2 }
 0x57f   : > { %v1948_v24 = vsel %vm589_vm9, %v1938_v2, %v1940_v7  ;;  %v2609_v2 = vld [vmem:[%s3557_s9 + $0xc] sm:$0xf] }
 0x581   : > { %v2014_v9 = vpop.permute.xlu1 %2013 }
 0x582   : > { %v3332_v10 = vpop.permute.xlu0 %2011 }
 0x583   : > { %v2022_v56 = vsel %vm658_vm10, %v3332_v10, %v2014_v9 }
 0x585   : > { %v3334_v11 = vpop.permute.xlu1 %2085 }
 0x586   : > { %v2010_v12 = vpop.permute.xlu0 %2009 }
 0x587   : > { %v2021_v61 = vsel %vm658_vm10, %v2010_v12, %v3332_v10 }
 0x589   : > { %v3336_v13 = vpop.permute.xlu1 %2083 }
 0x58a   : > { %v3338_v14 = vpop.permute.xlu0 %2087  ;;  %v2095_v7 = vsel %vm723_vm12, %v3336_v13, %v3334_v11 }
 0x58b   : > { %v2096_v0 = vsel %vm723_vm12, %v3334_v11, %v3338_v14  ;;  %v2612_v14 = vld [vmem:[%s3557_s9 + $0x10] sm:$0xf] }
 0x58d   : > { %v3340_v16 = vpop.permute.xlu1 %2159 }
 0x58e   : > { %v3342_v17 = vpop.permute.xlu0 %2157 }
 0x58f   : > { %v2168_v12 = vsel %vm786_vm11, %v3342_v17, %v3340_v16 }
 0x591   : > { %v3344_v18 = vpop.permute.xlu1 %2231 }
 0x592   : > { %v3346_v19 = vpop.permute.xlu0 %2155 }
 0x595   : > { %v3348_v20 = vpop.permute.xlu1 %2229 }
 0x596   : > { %v3350_v21 = vpop.permute.xlu0 %2233 }
 0x599   : > { %v3352_v22 = vpop.permute.xlu1 %2307 }
 0x59a   : > { %v3354_v3 = vpop.permute.xlu0 %2305 }
 0x59d   : > { %v1946_v4 = vpop.permute.xlu1 %1945 }
 0x59e   : > { %v3356_v26 = vpop.permute.xlu0 %2303 }
 0x5a1   : > { %v2094_v27 = vpop.permute.xlu1 %2093 }
 0x5a2   : > { %v1874_v28 = vpop.permute.xlu0 %1873 }
 0x5a5   : > { %v3358_v29 = vpop.permute.xlu1 %2239 }
 0x5a6   : > { %v2020_v30 = vpop.permute.xlu0 %2019 }
 0x5a9   : > { %v3360_v31 = vpop.permute.xlu1 %2385 }
 0x5aa   : > { %v2166_v32 = vpop.permute.xlu0 %2165 }
 0x5ad   : > { %v1872_v33 = vpop.permute.xlu1 %1871 }
 0x5ae   : > { %v1878_v34 = vsel %vm526_vm8, %v1872_v33, %v1874_v28  ;;  %v3363_v35 = vpop.permute.xlu0 %2313 }
 0x5af   : > { %2604 = vmatprep.subr.msk.bf16.mxu1 %vm3616_vm4, %v1878_v34 }
 0x5b1   : > { %v1942_v36 = vpop.permute.xlu1 %1941 }
 0x5b2   : > { %v1870_v37 = vpop.permute.xlu0 %1869 }
 0x5b3   : > { %v1877_v38 = vsel %vm526_vm8, %v1870_v37, %v1872_v33  ;;  %vm3620_vm8 = vmmov %vm3616_vm4  ;;  %v2241_v33 = vsel %vm851_vm14, %v3348_v20, %v3344_v18 }
 0x5b4   : > { %v1885_v39 = vsel %vm3617_vm5, %v1877_v38, 0  ;;  %vm3622_vm5 = vmmov %vm3616_vm4  ;;  %v2315_v38 = vsel %vm916_vm13, %v3356_v26, %v3354_v3  ;;  %v2624_v26 = vld [vmem:[%s3557_s9 + $0x20] sm:$0xf] }
 0x5b5   : > { %v2018_v40 = vpop.permute.xlu1 %2017  ;;  %1903 = vmatpush1.bf16.msra.mxu1 %v1885_v39 }
 0x5b6   : > { %1904 = vmatprep.subr.bf16.mxu1 %v1876_v41  ;;  %v1944_v42 = vpop.permute.xlu0 %1943  ;;  %v2024_v43 = vsel %vm658_vm10, %v2018_v40, %v2020_v30 }
 0x5b7   : > { %v1949_v44 = vsel %vm589_vm9, %v1942_v36, %v1944_v42  ;;  %v1950_v45 = vsel %vm589_vm9, %v1944_v42, %v1946_v4  ;;  %vm3621_vm9 = vmmov %vm3616_vm4  ;;  %v2618_v36 = vld [vmem:[%s3557_s9 + $0x18] sm:$0xf] }
 0x5b8   : > { %v1957_v50 = vsel %vm3618_vm15, %v1949_v44, 0  ;;  %2607 = vmatprep.subr.msk.bf16.mxu0 %vm3619_vm6, %v1950_v45  ;;  %vm3624_vm15 = vmmov %vm3616_vm4 }
 0x5b9   : > { %v2090_v47 = vpop.permute.xlu1 %2089  ;;  %1905 = vmatpush1.bf16.msra.mxu1 %v1875_v46  ;;  %1975 = vmatpush1.bf16.msra.mxu0 %v1957_v50  ;;  %vm3626_vm6 = vmmov %vm3616_vm4 }
 0x5ba   : > { %2610 = vmatprep.subr.msk.bf16.mxu1 %vm3616_vm4, %v2024_v43  ;;  %v2016_v51 = vpop.permute.xlu0 %2015  ;;  %1976 = vmatprep.subr.bf16.mxu0 %v1948_v24 }
 0x5bb   : > { %v2023_v23 = vsel %vm658_vm10, %v2016_v51, %v2018_v40  ;;  %vm3623_vm10 = vmmov %vm3616_vm4  ;;  %v2621_v40 = vld [vmem:[%s3557_s9 + $0x1c] sm:$0xf] }
 0x5bc   : > { %v2031_v54 = vsel %vm3620_vm8, %v2023_v23, 0  ;;  %2605 = vmatmul.mubr.msk.bf16.vlgmr.msra.gmra.mxu1 %vm1779_vm0, %v2597_v8 }
 0x5bd   : > { %v2164_v55 = vpop.permute.xlu1 %2163  ;;  %1977 = vmatpush1.bf16.msra.mxu0 %v1947_v25  ;;  %2049 = vmatpush1.bf16.msra.mxu1 %v2031_v54 }
 0x5be   : > { %2050 = vmatprep.subr.bf16.mxu1 %v2022_v56  ;;  %v2092_v58 = vpop.permute.xlu0 %2091  ;;  %2068 = vmatprep.mubr.bf16.mxu1 %v2769_v1  ;;  %v2170_v62 = vsel %vm786_vm11, %v2164_v55, %v2166_v32 }
 0x5bf   : > { %v2097_v59 = vsel %vm723_vm12, %v2090_v47, %v2092_v58  ;;  %v2098_v60 = vsel %vm723_vm12, %v2092_v58, %v2094_v27  ;;  %v2167_v27 = vsel %vm786_vm11, %v3346_v19, %v3342_v17  ;;  %vm3625_vm12 = vmmov %vm3616_vm4  ;;  %v2615_v17 = vld [vmem:[%s3557_s9 + $0x14] sm:$0xf] }
 0x5c0   : > { %v2105_v15 = vsel %vm3621_vm9, %v2097_v59, 0  ;;  %2608 = vmatmul.mubr.msk.bf16.vlgmr.msra.gmra.mxu0 %vm1779_vm0, %v2606_v57  ;;  %2613 = vmatprep.subr.msk.bf16.mxu0 %vm3622_vm5, %v2098_v60  ;;  %vm3630_vm9 = vmmov %vm3616_vm4 }
 0x5c1   : > { %v2236_v63 = vpop.permute.xlu1 %2235  ;;  %2051 = vmatpush1.bf16.msra.mxu1 %v2021_v61  ;;  %2123 = vmatpush1.bf16.msra.mxu0 %v2105_v15  ;;  %vm3631_vm5 = vmmov %vm3616_vm4 }
 0x5c2   : > { %2616 = vmatprep.subr.msk.bf16.mxu1 %vm3623_vm10, %v2170_v62  ;;  %v2162_v5 = vpop.permute.xlu0 %2161  ;;  %2124 = vmatprep.subr.bf16.mxu0 %v2096_v0 }
 0x5c3   : > { %v2169_v6 = vsel %vm786_vm11, %v2162_v5, %v2164_v55  ;;  %2142 = vmatprep.mubr.bf16.mxu0 %v2769_v1  ;;  %vm3627_vm11 = vmmov %vm3616_vm4 }
 0x5c4   : > { %v2177_v9 = vsel %vm3624_vm15, %v2169_v6, 0  ;;  %2611 = vmatmul.mubr.msk.bf16.vlgmr.msra.gmra.mxu1 %vm1779_vm0, %v2609_v2 }
 0x5c5   : > { %v2312_v10 = vpop.permute.xlu1 %2311  ;;  %2125 = vmatpush1.bf16.msra.mxu0 %v2095_v7  ;;  %2195 = vmatpush1.bf16.msra.mxu1 %v2177_v9 }
 0x5c6   : > { %2196 = vmatprep.subr.bf16.mxu1 %v2168_v12  ;;  %v2238_v4 = vpop.permute.xlu0 %2237  ;;  %2214 = vmatprep.mubr.bf16.mxu1 %v2769_v1  ;;  %v2318_v16 = vsel %vm916_vm13, %v2312_v10, %v3363_v35  ;;  %v2316_v35 = vsel %vm916_vm13, %v3354_v3, %v3352_v22 }
 0x5c7   : > { %v2243_v11 = vsel %vm851_vm14, %v2236_v63, %v2238_v4  ;;  %v2244_v13 = vsel %vm851_vm14, %v2238_v4, %v3358_v29  ;;  %v2242_v29 = vsel %vm851_vm14, %v3344_v18, %v3350_v21  ;;  %vm3628_vm14 = vcmask 769024  }
 0x5c8   : > { %v2251_v28 = vsel %vm3625_vm12, %v2243_v11, 0  ;;  %2614 = vmatmul.mubr.msk.bf16.vlgmr.msra.gmra.mxu0 %vm1779_vm0, %v2612_v14  ;;  %2619 = vmatprep.subr.msk.bf16.mxu0 %vm3626_vm6, %v2244_v13  ;;  %vm3629_vm8 = vmmov %vm3628_vm14 }
 0x5c9   : > { %v2382_v30 = vpop.permute.xlu1 %2381  ;;  %2197 = vmatpush1.bf16.msra.mxu1 %v2167_v27  ;;  %2269 = vmatpush1.bf16.msra.mxu0 %v2251_v28  ;;  %vm3632_vm10 = vmmov %vm3629_vm8 }
 0x5ca   : > { %2622 = vmatprep.subr.msk.bf16.mxu1 %vm3627_vm11, %v2318_v16  ;;  %v2310_v19 = vpop.permute.xlu0 %2309  ;;  %2270 = vmatprep.subr.bf16.mxu0 %v2242_v29  ;;  %vm3633_vm15 = vmmov %vm3629_vm8  ;;  %v1823_v42 = vpop.f32.mrf.mxu0 }
 0x5cb   : > { %v2317_v32 = vsel %vm916_vm13, %v2310_v19, %v2312_v10  ;;  %2288 = vmatprep.mubr.bf16.mxu0 %v2769_v1  ;;  %v1830_v55 = vsel %vm3054_vm1, %v1823_v42, 0.0 }
 0x5cc   : > { %v2325_v34 = vsel %vm3616_vm4, %v2317_v32, 0  ;;  %2617 = vmatmul.mubr.msk.bf16.vlgmr.msra.gmra.mxu1 %vm1779_vm0, %v2615_v17  ;;  %v1825_v44 = vpop.f32.mrf.mxu0 }
 0x5cd   : > { %v2378_v21 = vpop.permute.xlu1 %2377  ;;  %2271 = vmatpush1.bf16.msra.mxu0 %v2241_v33  ;;  %2343 = vmatpush1.bf16.msra.mxu1 %v2325_v34  ;;  %v1831_v60 = vsel %vm3062_vm3, %v1825_v44, 0.0 }
 0x5ce   : > { %2344 = vmatprep.subr.bf16.mxu1 %v2316_v35  ;;  %v2384_v37 = vpop.permute.xlu0 %2383  ;;  %2362 = vmatprep.mubr.bf16.mxu1 %v2769_v1  ;;  %v1827_v45 = vpop.f32.mrf.mxu0 }
 0x5cf   : > { %v2389_v18 = vsel %vm3628_vm14, %v2382_v30, %v2384_v37  ;;  %v2390_v20 = vsel %vm3629_vm8, %v2384_v37, %v3360_v31 }
 0x5d0   : > { %v2397_v39 = vsel %vm3630_vm9, %v2389_v18, 0  ;;  %2620 = vmatmul.mubr.msk.bf16.vlgmr.msra.gmra.mxu0 %vm1779_vm0, %v2618_v36  ;;  %2625 = vmatprep.subr.msk.bf16.mxu0 %vm3631_vm5, %v2390_v20  ;;  %v1828_v46 = vpop.f32.mrf.mxu0 }
 0x5d1   : > { %v2376_v22 = vpop.permute.xlu1 %2375  ;;  %2345 = vmatpush1.bf16.msra.mxu1 %v2315_v38  ;;  %2415 = vmatpush1.bf16.msra.mxu0 %v2397_v39 }
 0x5d2   : > { %v2380_v41 = vpop.permute.xlu0 %2379  ;;  %2434 = vmatprep.mubr.bf16.mxu0 %v2769_v1  ;;  %v2387_v3 = vsel %vm3633_vm15, %v2376_v22, %v2378_v21 }
 0x5d3   : > { %v2388_v31 = vsel %vm3632_vm10, %v2378_v21, %v2380_v41 }
 0x5d4   : > { %2623 = vmatmul.mubr.msk.bf16.vlgmr.msra.gmra.mxu1 %vm1779_vm0, %v2621_v40  ;;  %2416 = vmatprep.subr.bf16.mxu0 %v2388_v31 }
 0x5d5   : > { %2417 = vmatpush1.bf16.msra.mxu0 %v2387_v3 }
 0x5d8   : > { %2626 = vmatmul.mubr.msk.bf16.vlgmr.msra.gmra.mxu0 %vm1779_vm0, %v2624_v26 }
 0x67c   : > { %v1924_v50 = vpop.f32.mrf.mxu1 }
 0x67d   : > { %v1931_v57 = vadd.f32 %v1924_v50, %v1830_v55 }
 0x67e   : > { %v1926_v1 = vpop.f32.mrf.mxu1 }
 0x67f   : > { %v1932_v62 = vadd.f32 %v1926_v1, %v1831_v60 }
 0x680   : > { %v1928_v43 = vpop.f32.mrf.mxu1  ;;  %v1996_v47 = vpop.f32.mrf.mxu0 }
 0x681   : > { %v2003_v56 = vsel %vm3058_vm2, %v1996_v47, 0.0 }
 0x682   : > { %v1929_v24 = vpop.f32.mrf.mxu1  ;;  %v1998_v8 = vpop.f32.mrf.mxu0  ;;  %v2005_v63 = vadd.f32 %v2003_v56, %v1931_v57 }
 0x683   : > { %v2004_v61 = vsel %vm3066_vm7, %v1998_v8, 0.0 }
 0x684   : > { %v2000_v51 = vpop.f32.mrf.mxu0  ;;  %v2070_v23 = vpop.f32.mrf.mxu1  ;;  %v2006_v6 = vadd.f32 %v2004_v61, %v1932_v62 }
 0x685   : > { %v2077_v15 = vsel %vm3054_vm1, %v2070_v23, 0.0 }
 0x686   : > { %v2001_v25 = vpop.f32.mrf.mxu0  ;;  %v2072_v54 = vpop.f32.mrf.mxu1  ;;  %v2079_v7 = vadd.f32 %v2077_v15, %v2005_v63 }
 0x687   : > { %v2078_v5 = vsel %vm3062_vm3, %v2072_v54, 0.0 }
 0x688   : > { %v2074_v58 = vpop.f32.mrf.mxu1  ;;  %v2144_v59 = vpop.f32.mrf.mxu0  ;;  %v2080_v12 = vadd.f32 %v2078_v5, %v2006_v6 }
 0x689   : > { %v2151_v13 = vadd.f32 %v2144_v59, %v2079_v7 }
 0x68a   : > { %v2075_v0 = vpop.f32.mrf.mxu1  ;;  %v2146_v2 = vpop.f32.mrf.mxu0 }
 0x68b   : > { %v2152_v29 = vadd.f32 %v2146_v2, %v2080_v12 }
 0x68c   : > { %v2148_v9 = vpop.f32.mrf.mxu0  ;;  %v2216_v10 = vpop.f32.mrf.mxu1 }
 0x68d   : > { %v2223_v11 = vsel %vm3058_vm2, %v2216_v10, 0.0 }
 0x68e   : > { %v2149_v14 = vpop.f32.mrf.mxu0  ;;  %v2218_v4 = vpop.f32.mrf.mxu1  ;;  %v2225_v17 = vadd.f32 %v2223_v11, %v2151_v13 }
 0x68f   : > { %v2224_v16 = vsel %vm3066_vm7, %v2218_v4, 0.0 }
 0x690   : > { %v2220_v27 = vpop.f32.mrf.mxu1  ;;  %v2290_v28 = vpop.f32.mrf.mxu0  ;;  %v2226_v34 = vadd.f32 %v2224_v16, %v2152_v29 }
 0x691   : > { %v2297_v30 = vsel %vm3054_vm1, %v2290_v28, 0.0 }
 0x692   : > { %v2221_v19 = vpop.f32.mrf.mxu1  ;;  %v2292_v32 = vpop.f32.mrf.mxu0  ;;  %v2299_v21 = vadd.f32 %v2297_v30, %v2225_v17 }
 0x693   : > { %v2298_v33 = vsel %vm3062_vm3, %v2292_v32, 0.0 }
 0x694   : > { %v2294_v35 = vpop.f32.mrf.mxu0  ;;  %v2364_v36 = vpop.f32.mrf.mxu1  ;;  %v2300_v37 = vadd.f32 %v2298_v33, %v2226_v34 }
 0x695   : > { %v2371_v38 = vadd.f32 %v2364_v36, %v2299_v21 }
 0x696   : > { %v2295_v18 = vpop.f32.mrf.mxu0  ;;  %v2366_v20 = vpop.f32.mrf.mxu1 }
 0x697   : > { %v2372_v52 = vadd.f32 %v2366_v20, %v2300_v37 }
 0x698   : > { %v2436_v48 = vpop.f32.mrf.mxu0  ;;  %v2368_v39 = vpop.f32.mrf.mxu1 }
 0x699   : > { %v2443_v22 = vsel %vm3058_vm2, %v2436_v48, 0.0 }
 0x69a   : > { %v2445_v40 = vadd.f32 %v2443_v22, %v2371_v38  ;;  %v2438_v41 = vpop.f32.mrf.mxu0  ;;  %v2369_v31 = vpop.f32.mrf.mxu1 }
 0x69b   : > { %v2444_v3 = vsel %vm3066_vm7, %v2438_v41, 0.0 }
 0x69c   : > { %2447 = vst [vmem:[%s2907_s25 + $0x30] sm:$0xff] %v2445_v40  ;;  %v2446_v49 = vadd.f32 %v2444_v3, %v2372_v52  ;;  %v2440_v26 = vpop.f32.mrf.mxu0 }
 0x69e   : > { %2448 = vst [vmem:[%s2907_s25 + $0x38] sm:$0xff] %v2446_v49  ;;  %v2441_v42 = vpop.f32.mrf.mxu0 }
 0x69f   : > { %2720 = shalt.err (!%p2717_p3)
}
 0x6a0   : > { %s2721_s25 = scalar_lea.hbm %s3500_s18, 1024  ;;  %s2725_s4 = scalar_lea.hbm %s3558_s10, 2048 }
 0x6a1   : > { %p2722_p4 = scmp.ne.s32.totalorder %s3500_s18, %s2721_s25  ;;  %p2726_p9 = scmp.lt.s32.totalorder %s3500_s18, %s3558_s10 }
 0x6a2   : > { %p2727_p10 = scmp.lt.s32.totalorder %s2725_s4, %s2721_s25 }
 0x6a3   : > { %p2723_p7 = pnand %p2722_p4, %p2875_p5 }
 0x6a4   : > { %p2728_p11 = por %p2727_p10, %p2726_p9 }
 0x6a5   : > { %p2724_p8 = pneg %p2723_p7 }
 0x6a7   : > { %p2729_p12 = pnand %p2728_p11, %p2724_p8 }
 0x6a9   : > { %2732 = shalt.err (!%p2729_p12)
}
 0x6aa   : > { %s2780_s30 = smov 256   ;;  %s2781_s29 = smov 16  }
 0x6ab   : > { %2640 = dma.vmem_to_hbm [thread:$0]  (%p2875_p5), %s3502_s26, 1024, %s3500_s18, %s3508_s20, %s2780_s30, %s2780_s30, %s2781_s29  }
 0x6ac PF: > { %p2646_p13 = scmp.ge.s32.totalorder %s2767_s16, 2  ;;  %s2478_s12 = sand.u32 1, %s2755_s13  }
 0x6ad   : > { %s2479_s27 = scalar_lea.sflag [#allocation4], %s2478_s12 }
 0x6ae   : > { %p2643_p0 = pnand %p2646_p13, %p2879_p6 }
 0x6b0   : > { %p2644_p1 = pneg %p2643_p0 }
 0x6b2   : > { %2750 = dma.done.wait (%p2644_p1), %s2479_s27, 1024  }
 0x6b3   : > { %2752 = vsyncadd (%p2644_p1), %s2479_s27, 4294966272  ;;  %s3635_s28 = sld [smem:[#allocation6_spill]]  ;;  %p20_p2 = scmp.ge.s32.totalorder %s2862_s19, 4  }
 0x6b4   : > { %s3636_s13 = smov %s2759_s14  ;;  %s3637_s14 = smov %s2763_s15 }
 0x6b5   : > { %s3639_s16 = smov %s2862_s19  ;;  %22 = sbr.rel (!%p20_p2) target bundleno = 10 (0xa), region = 119 }
 0x6b9   : > { %s3638_s15 = smov %s3635_s28 }
 0x6ba   :  { %2484 = vsyncpa [#allocation4], 1 }
 0x6bb   :  { %2486 = vsyncpa [#allocation4 + $0x1], 1 }

</bundles_post_ra>
